<compile_context>
chip_gen: v6e
topology: v6e:2x2x1
jax: 0.10.0
libtpu: 0.0.40
codegen_flags: <defaults>
</compile_context>

<pallas_src>
import functools

import jax
import jax.numpy as jnp
from jax.experimental import pallas as pl
from jax.experimental.pallas import tpu as pltpu


def _attention_vq_kernel(x_ref, w_ref, o_ref, *, inv_t_tau):
    # x_ref: (bb, T, D)   w_ref: (K, D)   o_ref: (bb, D)
    x = x_ref[...].astype(jnp.float32)
    w = w_ref[...].astype(jnp.float32)

    # mean over T and the /tau of the logits folded into one scalar multiply
    x_scaled = jnp.sum(x, axis=1) * inv_t_tau                      # (bb, D)

    # logits = (mean(x)/tau) @ w.T without materializing a transpose of w
    logits = jax.lax.dot_general(
        x_scaled, w,
        dimension_numbers=(((1,), (1,)), ((), ())),
        preferred_element_type=jnp.float32)                        # (bb, K)

    # numerically-stable softmax over the codebook axis (exact divide;
    # approx reciprocal previously cost ~1e-2 absolute error)
    logits = logits - jnp.max(logits, axis=-1, keepdims=True)
    exp_l = jnp.exp(logits)
    denom = jnp.sum(exp_l, axis=-1, keepdims=True)
    probs = exp_l / denom                                          # (bb, K)

    # weighted sum of codebook vectors: (bb, K) @ (K, D)
    attn_vq = jnp.dot(probs, w, preferred_element_type=jnp.float32)
    o_ref[...] = attn_vq.astype(o_ref.dtype)


def _pick_block_b(B, max_bb=128):
    """Largest divisor of B that is <= max_bb and sublane-friendly."""
    for bb in range(min(B, max_bb), 0, -1):
        if B % bb == 0 and (bb % 8 == 0 or bb == B):
            return bb
    return B


def attention_vq(inputs, vq_weight, *, tau=1.0):
    """inputs: (B, T, D); vq_weight: (K, D) -> (B, D)."""
    B, T, D = inputs.shape
    K, D2 = vq_weight.shape
    assert D == D2, "inputs feature dim must match codebook dim"

    bb = _pick_block_b(B)
    grid = (B // bb,)

    kernel = functools.partial(
        _attention_vq_kernel, inv_t_tau=1.0 / (float(T) * float(tau)))

    return pl.pallas_call(
        kernel,
        out_shape=jax.ShapeDtypeStruct((B, D), inputs.dtype),
        grid=grid,
        in_specs=[
            # per-step batch tile of the inputs (double-buffered by Pallas)
            pl.BlockSpec((bb, T, D), lambda i: (i, 0, 0)),
            # codebook: same block every step -> stays resident in VMEM
            pl.BlockSpec((K, D), lambda i: (0, 0)),
        ],
        out_specs=pl.BlockSpec((bb, D), lambda i: (i, 0)),
        compiler_params=pltpu.CompilerParams(
            dimension_semantics=("parallel",)),
    )(inputs, vq_weight)


def attention_vq_ref(inputs, vq_weight, *, tau=1.0):
    x_mean = jnp.mean(inputs, axis=1)
    logits = (x_mean @ vq_weight.T) / tau
    probs = jax.nn.softmax(logits, axis=-1)
    return probs @ vq_weight


if __name__ == "__main__":
    # Small but MXU/grid-friendly shapes consistent with the module's forward:
    # B batch rows (128 rows per grid step), T=8 tokens, D=32 hidden, K=16 codes.
    key = jax.random.PRNGKey(0)
    k_in, k_emb = jax.random.split(key)
    B, T, D, K = 256, 8, 32, 16
    tau = 0.5  # the module's dropout attribute is unused in its forward

    inputs = jax.random.normal(k_in, (B, T, D), dtype=jnp.float32)
    # nn.Embedding(K, D).weight ~ N(0, 1), initialized deterministically here
    vq_weight = jax.random.normal(k_emb, (K, D), dtype=jnp.float32)

    out = attention_vq(inputs, vq_weight, tau=tau)
    out = jax.block_until_ready(out)

    ref = attention_vq_ref(inputs, vq_weight, tau=tau)
    assert out.shape == (B, D)
    err = float(jnp.max(jnp.abs(out - ref)))
    assert jnp.allclose(out, ref, atol=1e-4, rtol=1e-4), err

    print("KERNEL_OK")
</pallas_src>

<mosaic_0001>
module attributes {stable_mosaic.version = 11 : i64} {
  func.func @_attention_vq_kernel(%arg0: i32, %arg1: memref<128x8x32xf32, #tpu.memory_space<vmem>>, %arg2: memref<16x32xf32, #tpu.memory_space<vmem>>, %arg3: memref<128x32xf32, #tpu.memory_space<vmem>>) attributes {dimension_semantics = [#tpu.dimension_semantics<parallel>], iteration_bounds = array<i64: 2>, scalar_prefetch = 0 : i64, scratch_operands = 0 : i64, tpu.core_type = #tpu.core_type<tc>, window_params = [{transform_indices = @transform_0, window_bounds = array<i64: 128, 8, 32>}, {pipeline_mode = #tpu.pipeline_mode<synchronous>, transform_indices = @transform_1, window_bounds = array<i64: 16, 32>}, {transform_indices = @transform_2, window_bounds = array<i64: 128, 32>}]} {
    %c0 = arith.constant 0 : index
    %c0_0 = arith.constant 0 : index
    %c0_1 = arith.constant 0 : index
    %0 = vector.load %arg1[%c0, %c0_0, %c0_1] : memref<128x8x32xf32, #tpu.memory_space<vmem>>, vector<128x8x32xf32>
    %c0_2 = arith.constant 0 : index
    %c0_3 = arith.constant 0 : index
    %1 = vector.load %arg2[%c0_2, %c0_3] : memref<16x32xf32, #tpu.memory_space<vmem>>, vector<16x32xf32>
    %cst = arith.constant dense<0.000000e+00> : vector<128x32xf32>
    %2 = vector.multi_reduction <add>, %0, %cst [1] : vector<128x8x32xf32> to vector<128x32xf32>
    %cst_4 = arith.constant 2.500000e-01 : f32
    %3 = vector.broadcast %cst_4 : f32 to vector<128x32xf32>
    %4 = arith.mulf %2, %3 : vector<128x32xf32>
    %cst_5 = arith.constant dense<0.000000e+00> : vector<128x16xf32>
    %5 = tpu.matmul %4, %1, %cst_5 {dimension_numbers = #tpu.dot_dimension_numbers<[1], [1], [0], [0], [0, 0, 1, 0], [], []>} : vector<128x32xf32>, vector<16x32xf32>, vector<128x16xf32> -> vector<128x16xf32>
    %cst_6 = arith.constant dense<0xFF800000> : vector<128xf32>
    %6 = vector.multi_reduction <maximumf>, %5, %cst_6 [1] : vector<128x16xf32> to vector<128xf32>
    %7 = vector.shape_cast %6 : vector<128xf32> to vector<128x1xf32>
    %8 = vector.broadcast %7 : vector<128x1xf32> to vector<128x16xf32>
    %9 = arith.subf %5, %8 : vector<128x16xf32>
    %10 = math.exp %9 : vector<128x16xf32>
    %cst_7 = arith.constant dense<0.000000e+00> : vector<128xf32>
    %11 = vector.multi_reduction <add>, %10, %cst_7 [1] : vector<128x16xf32> to vector<128xf32>
    %12 = vector.shape_cast %11 : vector<128xf32> to vector<128x1xf32>
    %13 = vector.broadcast %12 : vector<128x1xf32> to vector<128x16xf32>
    %14 = arith.divf %10, %13 : vector<128x16xf32>
    %cst_8 = arith.constant dense<0.000000e+00> : vector<128x32xf32>
    %15 = tpu.matmul %14, %1, %cst_8 {dimension_numbers = #tpu.dot_dimension_numbers<[1], [0], [0], [1], [0, 0, 1, 1], [], []>} : vector<128x16xf32>, vector<16x32xf32>, vector<128x32xf32> -> vector<128x32xf32>
    %c0_9 = arith.constant 0 : index
    %c0_10 = arith.constant 0 : index
    %16 = vector.load %arg3[%c0_9, %c0_10] : memref<128x32xf32, #tpu.memory_space<vmem>>, vector<128x32xf32>
    tpu.vector_store %arg3[%c0_9, %c0_10], %15 {strides = array<i32>} : memref<128x32xf32, #tpu.memory_space<vmem>>, vector<128x32xf32>,
    return
  }
  func.func @transform_0(%arg0: i32) -> (i32, i32, i32) {
    %c0_i32 = arith.constant 0 : i32
    %c0_i32_0 = arith.constant 0 : i32
    %c0_i32_1 = arith.constant 0 : i32
    return %arg0, %c0_i32, %c0_i32_0 : i32, i32, i32
  }
  func.func @transform_1(%arg0: i32) -> (i32, i32) {
    %c0_i32 = arith.constant 0 : i32
    %c0_i32_0 = arith.constant 0 : i32
    %c0_i32_1 = arith.constant 0 : i32
    return %c0_i32, %c0_i32_0 : i32, i32
  }
  func.func @transform_2(%arg0: i32) -> (i32, i32) {
    %c0_i32 = arith.constant 0 : i32
    %c0_i32_0 = arith.constant 0 : i32
    return %arg0, %c0_i32 : i32, i32
  }
}

</mosaic_0001>

<bundles_post_ra>
// kernel: tpu_custom_call.1
= control target key start
LH: loop header
LB: loop body
LE: loop exit
PB: predicated region body
PF: predicated region fallthrough
CT: control target
= control target key end

     0   :  { %s2406_s9 = smov 0   ;;  %s3017_s0 = inlined_call_operand.vmem [shape: f32[256,8,32], index: 0, kind: input, shape index: {}]   ;;  %s3018_s1 = inlined_call_operand.vmem [shape: f32[16,32], index: 1, kind: input, shape index: {}]   ;;  %s3019_s2 = inlined_call_operand.vmem [shape: f32[256,32], index: 2, kind: output, shape index: {}]  }
   0x1 LB: > { %s2174_s10 = sadd.s32 4294967295, %s2389_s9   ;;  %p2178_p0 = scmp.ge.s32.totalorder %s2389_s9, 1  ;;  %s2389_s9 = sphi %s2406_s9, %s12_s9  }
   0x2   : > { %p113_p1 = scmp.lt.s32.totalorder %s2389_s9, 3 }
   0x4   : > { %p114_p2 = pnand %p2178_p0, %p113_p1 }
   0x5   : > { %s2179_s15 = sshll.u32 (!%p114_p2), %s2174_s10, 7  ;;  %s2181_s20 = sshll.u32 (!%p114_p2), %s2174_s10, 4 }
   0x6   : > { %117 = sbr.rel (%p114_p2) target bundleno = 1008 (0x3f0), region = 28  ;;  %p136_p3 = scmp.lt.s32.totalorder (!%p114_p2), %s2179_s15, 255 }
   0x7   : > { %p142_p4 = scmp.lt.s32.totalorder (!%p114_p2), %s2181_s20, 31 }
   0xb   : > { %v276_v0 = vld [vmem:[%s3018_s1 + $0x8] sm:$0xff]  ;;  %vm277_vm0 = vcmask 261120   ;;  %v275_v1 = vld [vmem:[%s3018_s1] sm:$0xff]  ;;  %s3021_s15 = smov (!%p136_p3, %s2179_s15), 255  ;;  %vm1430_vm1 = vcmask 1041409   ;;  %vm1432_vm2 = vcmask 1042434  }
   0xc   : > { %2255 = vmatprep.subr.msk.mxu0 %vm277_vm0, %v276_v0  ;;  %2283 = vmatprep.subr.mxu1 %v276_v0  ;;  %s2180_s16 = sshll.u32 %s3021_s15, 3  ;;  %vm1434_vm3 = vcmask 1043459   ;;  %vm1436_vm4 = vcmask 1044484   ;;  %vm1438_vm5 = vcmask 1045509   ;;  %vm1440_vm6 = vcmask 1046534   ;;  %s3023_s20 = smov (!%p142_p4, %s2181_s20), 31 }
   0xd   : > { %2256 = vmatpush3.xpose.msk.msra.mxu0 %vm277_vm0, %v276_v0  ;;  %2284 = vmatpush3.msra.mxu1 %v276_v0  ;;  %s2429_s19 = scalar_lea.vmem %s3017_s0, %s2180_s16  ;;  %vm1442_vm7 = vcmask 1047559   ;;  %vm1732_vm8 = vcmask 130048   ;;  %s2182_s21 = sshll.u32 %s3023_s20, 3 }
   0xe   : > { %2257 = vmatprep.subr.msk.mxu0 %vm277_vm0, %v275_v1  ;;  %2285 = vmatprep.subr.mxu1 %v275_v1  ;;  %v147_v2 = vld [vmem:[%s2429_s19] sm:$0xff]  ;;  %v148_v3 = vld [vmem:[%s2429_s19 + $0x8] sm:$0xff]  ;;  %v149_v4 = vld [vmem:[%s2429_s19 + $0x10] sm:$0xff]  ;;  %s2980_s24 = scalar_lea.vmem %s3019_s2, %s2182_s21 }
   0xf   : > { %2286 = vmatpush3.msra.mxu1 %v275_v1  ;;  %v150_v5 = vld [vmem:[%s2429_s19 + $0x18] sm:$0xff]  ;;  %v151_v6 = vld [vmem:[%s2429_s19 + $0x20] sm:$0xff]  ;;  %v152_v7 = vld [vmem:[%s2429_s19 + $0x28] sm:$0xff]  ;;  %v278_v8 = vsel %vm277_vm0, %v147_v2, 0.0  ;;  %v285_v9 = vsel %vm277_vm0, %v148_v3, 0.0  ;;  %v292_v10 = vsel %vm277_vm0, %v149_v4, 0.0 }
  0x10   : > { %v153_v11 = vld [vmem:[%s2429_s19 + $0x30] sm:$0xff]  ;;  %v154_v12 = vld [vmem:[%s2429_s19 + $0x38] sm:$0xff]  ;;  %v279_v13 = vrot.slane %v278_v8, 4  ;;  %v286_v14 = vrot.slane %v285_v9, 4  ;;  %v293_v15 = vrot.slane %v292_v10, 4  ;;  %v299_v16 = vsel %vm277_vm0, %v150_v5, 0.0 }
  0x11   : > { %2258 = vmatpush3.xpose.msk.msra.mxu0 %vm277_vm0, %v275_v1  ;;  %v300_v17 = vrot.slane %v299_v16, 4  ;;  %v306_v18 = vsel %vm277_vm0, %v151_v6, 0.0  ;;  %v313_v19 = vsel %vm277_vm0, %v152_v7, 0.0  ;;  %v320_v20 = vsel %vm277_vm0, %v153_v11, 0.0  ;;  %v155_v61 = vld [vmem:[%s2429_s19 + $0x40] sm:$0xff]  ;;  %v156_v62 = vld [vmem:[%s2429_s19 + $0x48] sm:$0xff] }
  0x12   : > { %v280_v21 = vadd.f32 %v279_v13, %v278_v8  ;;  %v287_v22 = vadd.f32 %v286_v14, %v285_v9  ;;  %v294_v23 = vadd.f32 %v293_v15, %v292_v10  ;;  %v307_v24 = vrot.slane %v306_v18, 4  ;;  %v157_v7 = vld [vmem:[%s2429_s19 + $0x50] sm:$0xff]  ;;  %v158_v10 = vld [vmem:[%s2429_s19 + $0x58] sm:$0xff] }
  0x13   : > { %v301_v25 = vadd.f32 %v300_v17, %v299_v16  ;;  %v314_v26 = vrot.slane %v313_v19, 4  ;;  %v321_v27 = vrot.slane %v320_v20, 4  ;;  %v327_v28 = vsel %vm277_vm0, %v154_v12, 0.0 }
  0x14   : > { %v281_v29 = vrot.slane %v280_v21, 2  ;;  %v288_v30 = vrot.slane %v287_v22, 2  ;;  %v295_v31 = vrot.slane %v294_v23, 2  ;;  %v308_v32 = vadd.f32 %v307_v24, %v306_v18  ;;  %v159_v18 = vld [vmem:[%s2429_s19 + $0x60] sm:$0xff] }
  0x15   : > { %v302_v33 = vrot.slane %v301_v25, 2  ;;  %v315_v34 = vadd.f32 %v314_v26, %v313_v19  ;;  %v322_v35 = vadd.f32 %v321_v27, %v320_v20  ;;  %v328_v36 = vrot.slane %v327_v28, 4  ;;  %v160_v19 = vld [vmem:[%s2429_s19 + $0x68] sm:$0xff] }
  0x16   : > { %v282_v37 = vadd.f32 %v281_v29, %v280_v21  ;;  %v289_v38 = vadd.f32 %v288_v30, %v287_v22  ;;  %v296_v39 = vadd.f32 %v295_v31, %v294_v23  ;;  %v309_v40 = vrot.slane %v308_v32, 2 }
  0x17   : > { %v303_v41 = vadd.f32 %v302_v33, %v301_v25  ;;  %v316_v42 = vrot.slane %v315_v34, 2  ;;  %v323_v43 = vrot.slane %v322_v35, 2  ;;  %v329_v44 = vadd.f32 %v328_v36, %v327_v28  ;;  %v161_v28 = vld [vmem:[%s2429_s19 + $0x70] sm:$0xff] }
  0x18   : > { %v283_v45 = vrot.slane %v282_v37, 1  ;;  %v290_v46 = vrot.slane %v289_v38, 1  ;;  %v297_v47 = vrot.slane %v296_v39, 1  ;;  %v310_v48 = vadd.f32 %v309_v40, %v308_v32 }
  0x19   : > { %v304_v49 = vrot.slane %v303_v41, 1  ;;  %v317_v50 = vadd.f32 %v316_v42, %v315_v34  ;;  %v324_v51 = vadd.f32 %v323_v43, %v322_v35  ;;  %v330_v52 = vrot.slane %v329_v44, 2 }
  0x1a   : > { %v284_v53 = vadd.f32 %v283_v45, %v282_v37  ;;  %v291_v54 = vadd.f32 %v290_v46, %v289_v38  ;;  %v298_v55 = vadd.f32 %v297_v47, %v296_v39  ;;  %v311_v56 = vrot.slane %v310_v48, 1  ;;  %v162_v37 = vld [vmem:[%s2429_s19 + $0x78] sm:$0xff] }
  0x1b   : > { %v305_v57 = vadd.f32 %v304_v49, %v303_v41  ;;  %v318_v58 = vrot.slane %v317_v50, 1  ;;  %v325_v59 = vrot.slane %v324_v51, 1  ;;  %v331_v60 = vadd.f32 %v330_v52, %v329_v44 }
  0x1c   : > { %v312_v63 = vadd.f32 %v311_v56, %v310_v48  ;;  %v1174_v0 = vmul.f32 0.25, %v284_v53  ;;  %v1175_v1 = vmul.f32 0.25, %v291_v54  ;;  %v1176_v2 = vmul.f32 0.25, %v298_v55 }
  0x1d   : > { %v319_v3 = vadd.f32 %v318_v58, %v317_v50  ;;  %v326_v4 = vadd.f32 %v325_v59, %v324_v51  ;;  %v332_v5 = vrot.slane %v331_v60, 1  ;;  %v1177_v6 = vmul.f32 0.25, %v305_v57 }
  0x1e   : > { %v1178_v8 = vmul.f32 0.25, %v312_v63  ;;  %v1431_v9 = vsel %vm1430_vm1, %v1175_v1, %v1174_v0  ;;  %v334_v11 = vsel %vm277_vm0, %v155_v61, 0.0  ;;  %v341_v12 = vsel %vm277_vm0, %v156_v62, 0.0 }
  0x1f   : > { %v333_v13 = vadd.f32 %v332_v5, %v331_v60  ;;  %v1179_v14 = vmul.f32 0.25, %v319_v3  ;;  %v1180_v15 = vmul.f32 0.25, %v326_v4  ;;  %v1433_v16 = vsel %vm1432_vm2, %v1176_v2, %v1431_v9  ;;  %v163_v5 = vld [vmem:[%s2429_s19 + $0x80] sm:$0xff] }
  0x20   : > { %v1435_v17 = vsel %vm1434_vm3, %v1177_v6, %v1433_v16  ;;  %v335_v20 = vrot.slane %v334_v11, 4  ;;  %v342_v21 = vrot.slane %v341_v12, 4  ;;  %v348_v22 = vsel %vm277_vm0, %v157_v7, 0.0 }
  0x21   : > { %v1181_v23 = vmul.f32 0.25, %v333_v13  ;;  %v1437_v24 = vsel %vm1436_vm4, %v1178_v8, %v1435_v17  ;;  %v349_v25 = vrot.slane %v348_v22, 4  ;;  %v355_v26 = vsel %vm277_vm0, %v158_v10, 0.0 }
  0x22   : > { %v1439_v27 = vsel %vm1438_vm5, %v1179_v14, %v1437_v24  ;;  %v336_v29 = vadd.f32 %v335_v20, %v334_v11  ;;  %v343_v30 = vadd.f32 %v342_v21, %v341_v12  ;;  %v356_v31 = vrot.slane %v355_v26, 4  ;;  %v164_v14 = vld [vmem:[%s2429_s19 + $0x88] sm:$0xff]  ;;  %v166_v24 = vld [vmem:[%s2429_s19 + $0x98] sm:$0xff] }
  0x23   : > { %v1441_v32 = vsel %vm1440_vm6, %v1180_v15, %v1439_v27  ;;  %v350_v33 = vadd.f32 %v349_v25, %v348_v22  ;;  %v362_v34 = vsel %vm277_vm0, %v159_v18, 0.0  ;;  %v369_v35 = vsel %vm277_vm0, %v160_v19, 0.0 }
  0x24   : > { %v1443_v36 = vsel %vm1442_vm7, %v1181_v23, %v1441_v32  ;;  %v337_v38 = vrot.slane %v336_v29, 2  ;;  %v344_v39 = vrot.slane %v343_v30, 2  ;;  %v357_v40 = vadd.f32 %v356_v31, %v355_v26  ;;  %v165_v23 = vld [vmem:[%s2429_s19 + $0x90] sm:$0xff]  ;;  %v167_v32 = vld [vmem:[%s2429_s19 + $0xa0] sm:$0xff] }
  0x25   : > { %2259 = vmatprep.mubr.msk.f32.mxu0 %vm277_vm0, %v1443_v36  ;;  %v351_v41 = vrot.slane %v350_v33, 2  ;;  %v363_v42 = vrot.slane %v362_v34, 4  ;;  %v370_v43 = vrot.slane %v369_v35, 4  ;;  %v376_v44 = vsel %vm277_vm0, %v161_v28, 0.0 }
  0x26   : > { %v338_v45 = vadd.f32 %v337_v38, %v336_v29  ;;  %v345_v46 = vadd.f32 %v344_v39, %v343_v30  ;;  %v358_v47 = vrot.slane %v357_v40, 2  ;;  %v377_v48 = vrot.slane %v376_v44, 4 }
  0x27   : > { %v352_v49 = vadd.f32 %v351_v41, %v350_v33  ;;  %v364_v50 = vadd.f32 %v363_v42, %v362_v34  ;;  %v371_v51 = vadd.f32 %v370_v43, %v369_v35  ;;  %v383_v52 = vsel %vm277_vm0, %v162_v37, 0.0 }
  0x28   : > { %v339_v53 = vrot.slane %v338_v45, 1  ;;  %v346_v54 = vrot.slane %v345_v46, 1  ;;  %v359_v55 = vadd.f32 %v358_v47, %v357_v40  ;;  %v378_v56 = vadd.f32 %v377_v48, %v376_v44  ;;  %v168_v40 = vld [vmem:[%s2429_s19 + $0xa8] sm:$0xff] }
  0x29   : > { %v353_v57 = vrot.slane %v352_v49, 1  ;;  %v365_v58 = vrot.slane %v364_v50, 2  ;;  %v372_v59 = vrot.slane %v371_v51, 2  ;;  %v384_v60 = vrot.slane %v383_v52, 4 }
  0x2a   : > { %v340_v61 = vadd.f32 %v339_v53, %v338_v45  ;;  %v347_v62 = vadd.f32 %v346_v54, %v345_v46  ;;  %v360_v63 = vrot.slane %v359_v55, 1  ;;  %v379_v0 = vrot.slane %v378_v56, 2 }
  0x2b   : > { %v354_v1 = vadd.f32 %v353_v57, %v352_v49  ;;  %v366_v2 = vadd.f32 %v365_v58, %v364_v50  ;;  %v373_v3 = vadd.f32 %v372_v59, %v371_v51  ;;  %v385_v4 = vadd.f32 %v384_v60, %v383_v52  ;;  %v169_v49 = vld [vmem:[%s2429_s19 + $0xb0] sm:$0xff]  ;;  %v170_v57 = vld [vmem:[%s2429_s19 + $0xb8] sm:$0xff] }
  0x2c   : > { %v361_v6 = vadd.f32 %v360_v63, %v359_v55  ;;  %v380_v7 = vadd.f32 %v379_v0, %v378_v56  ;;  %v1182_v8 = vmul.f32 0.25, %v340_v61  ;;  %v1183_v9 = vmul.f32 0.25, %v347_v62 }
  0x2d   : > { %v367_v10 = vrot.slane %v366_v2, 1  ;;  %v374_v11 = vrot.slane %v373_v3, 1  ;;  %v386_v12 = vrot.slane %v385_v4, 2  ;;  %v1184_v13 = vmul.f32 0.25, %v354_v1 }
  0x2e   : > { %v381_v15 = vrot.slane %v380_v7, 1  ;;  %v1185_v16 = vmul.f32 0.25, %v361_v6  ;;  %v1444_v17 = vsel %vm1430_vm1, %v1183_v9, %v1182_v8  ;;  %v390_v18 = vsel %vm277_vm0, %v163_v5, 0.0 }
  0x2f   : > { %v368_v19 = vadd.f32 %v367_v10, %v366_v2  ;;  %v375_v20 = vadd.f32 %v374_v11, %v373_v3  ;;  %v387_v21 = vadd.f32 %v386_v12, %v385_v4  ;;  %v1445_v22 = vsel %vm1432_vm2, %v1184_v13, %v1444_v17  ;;  %v171_v13 = vld [vmem:[%s2429_s19 + $0xc0] sm:$0xff] }
  0x30   : > { %v382_v25 = vadd.f32 %v381_v15, %v380_v7  ;;  %v1446_v26 = vsel %vm1434_vm3, %v1185_v16, %v1445_v22  ;;  %v391_v27 = vrot.slane %v390_v18, 4  ;;  %v397_v28 = vsel %vm277_vm0, %v164_v14, 0.0 }
  0x31   : > { %v388_v29 = vrot.slane %v387_v21, 1  ;;  %v1186_v30 = vmul.f32 0.25, %v368_v19  ;;  %v1187_v31 = vmul.f32 0.25, %v375_v20  ;;  %v398_v33 = vrot.slane %v397_v28, 4 }
  0x32   : > { %v1188_v34 = vmul.f32 0.25, %v382_v25  ;;  %v392_v35 = vadd.f32 %v391_v27, %v390_v18  ;;  %v404_v36 = vsel %vm277_vm0, %v165_v23, 0.0  ;;  %v411_v37 = vsel %vm277_vm0, %v166_v24, 0.0  ;;  %v172_v25 = vld [vmem:[%s2429_s19 + $0xc8] sm:$0xff] }
  0x33   : > { %v389_v38 = vadd.f32 %v388_v29, %v387_v21  ;;  %v1447_v39 = vsel %vm1436_vm4, %v1186_v30, %v1446_v26  ;;  %v399_v41 = vadd.f32 %v398_v33, %v397_v28  ;;  %v405_v42 = vrot.slane %v404_v36, 4 }
  0x34   : > { %v1448_v43 = vsel %vm1438_vm5, %v1187_v31, %v1447_v39  ;;  %v393_v44 = vrot.slane %v392_v35, 2  ;;  %v412_v45 = vrot.slane %v411_v37, 4  ;;  %v418_v46 = vsel %vm277_vm0, %v167_v32, 0.0 }
  0x35   : > { %v1189_v47 = vmul.f32 0.25, %v389_v38  ;;  %v1449_v48 = vsel %vm1440_vm6, %v1188_v34, %v1448_v43  ;;  %v400_v50 = vrot.slane %v399_v41, 2  ;;  %v406_v51 = vadd.f32 %v405_v42, %v404_v36  ;;  %v173_v34 = vld [vmem:[%s2429_s19 + $0xd0] sm:$0xff]  ;;  %v174_v43 = vld [vmem:[%s2429_s19 + $0xd8] sm:$0xff] }
  0x36   : > { %v394_v52 = vadd.f32 %v393_v44, %v392_v35  ;;  %v413_v53 = vadd.f32 %v412_v45, %v411_v37  ;;  %v419_v54 = vrot.slane %v418_v46, 4  ;;  %v425_v55 = vsel %vm277_vm0, %v168_v40, 0.0 }
  0x37   : > { %v1450_v56 = vsel %vm1442_vm7, %v1189_v47, %v1449_v48  ;;  %v401_v58 = vadd.f32 %v400_v50, %v399_v41  ;;  %v407_v59 = vrot.slane %v406_v51, 2  ;;  %v426_v60 = vrot.slane %v425_v55, 4 }
  0x38   : > { %2260 = vmatmul.mubr.msk.f32.vlgmr.msra.gmra.mxu0 %vm277_vm0, %v1450_v56  ;;  %v395_v61 = vrot.slane %v394_v52, 1  ;;  %v414_v62 = vrot.slane %v413_v53, 2  ;;  %v420_v63 = vadd.f32 %v419_v54, %v418_v46  ;;  %v432_v0 = vsel %vm277_vm0, %v169_v49, 0.0 }
  0x39   : > { %v402_v1 = vrot.slane %v401_v58, 1  ;;  %v408_v2 = vadd.f32 %v407_v59, %v406_v51  ;;  %v427_v3 = vadd.f32 %v426_v60, %v425_v55  ;;  %v433_v4 = vrot.slane %v432_v0, 4  ;;  %v175_v51 = vld [vmem:[%s2429_s19 + $0xe0] sm:$0xff]  ;;  %v177_v60 = vld [vmem:[%s2429_s19 + $0xf0] sm:$0xff] }
  0x3a   : > { %v396_v5 = vadd.f32 %v395_v61, %v394_v52  ;;  %v415_v6 = vadd.f32 %v414_v62, %v413_v53  ;;  %v421_v7 = vrot.slane %v420_v63, 2  ;;  %v439_v8 = vsel %vm277_vm0, %v170_v57, 0.0  ;;  %v176_v52 = vld [vmem:[%s2429_s19 + $0xe8] sm:$0xff] }
  0x3b   : > { %v403_v9 = vadd.f32 %v402_v1, %v401_v58  ;;  %v409_v10 = vrot.slane %v408_v2, 1  ;;  %v428_v11 = vrot.slane %v427_v3, 2  ;;  %v434_v12 = vadd.f32 %v433_v4, %v432_v0 }
  0x3c   : > { %v416_v14 = vrot.slane %v415_v6, 1  ;;  %v422_v15 = vadd.f32 %v421_v7, %v420_v63  ;;  %v440_v16 = vrot.slane %v439_v8, 4  ;;  %v1190_v17 = vmul.f32 0.25, %v396_v5 }
  0x3d   : > { %v410_v18 = vadd.f32 %v409_v10, %v408_v2  ;;  %v429_v19 = vadd.f32 %v428_v11, %v427_v3  ;;  %v435_v20 = vrot.slane %v434_v12, 2  ;;  %v1191_v21 = vmul.f32 0.25, %v403_v9 }
  0x3e   : > { %v417_v22 = vadd.f32 %v416_v14, %v415_v6  ;;  %v423_v23 = vrot.slane %v422_v15, 1  ;;  %v441_v24 = vadd.f32 %v440_v16, %v439_v8  ;;  %v446_v26 = vsel %vm277_vm0, %v171_v13, 0.0  ;;  %v178_v8 = vld [vmem:[%s2429_s19 + $0xf8] sm:$0xff] }
  0x3f   : > { %v430_v27 = vrot.slane %v429_v19, 1  ;;  %v436_v28 = vadd.f32 %v435_v20, %v434_v12  ;;  %v1192_v29 = vmul.f32 0.25, %v410_v18  ;;  %v1451_v30 = vsel %vm1430_vm1, %v1191_v21, %v1190_v17  ;;  %v179_v21 = vld [vmem:[%s2429_s19 + $0x100] sm:$0xff] }
  0x40   : > { %v424_v31 = vadd.f32 %v423_v23, %v422_v15  ;;  %v442_v32 = vrot.slane %v441_v24, 2  ;;  %v1193_v33 = vmul.f32 0.25, %v417_v22  ;;  %v447_v35 = vrot.slane %v446_v26, 4 }
  0x41   : > { %v431_v36 = vadd.f32 %v430_v27, %v429_v19  ;;  %v437_v37 = vrot.slane %v436_v28, 1  ;;  %v1452_v38 = vsel %vm1432_vm2, %v1192_v29, %v1451_v30  ;;  %v453_v39 = vsel %vm277_vm0, %v172_v25, 0.0 }
  0x42   : > { %v443_v40 = vadd.f32 %v442_v32, %v441_v24  ;;  %v1194_v41 = vmul.f32 0.25, %v424_v31  ;;  %v1453_v42 = vsel %vm1434_vm3, %v1193_v33, %v1452_v38  ;;  %v448_v44 = vadd.f32 %v447_v35, %v446_v26 }
  0x43   : > { %v438_v45 = vadd.f32 %v437_v37, %v436_v28  ;;  %v1195_v46 = vmul.f32 0.25, %v431_v36  ;;  %v454_v47 = vrot.slane %v453_v39, 4  ;;  %v460_v48 = vsel %vm277_vm0, %v173_v34, 0.0 }
  0x44   : > { %v444_v49 = vrot.slane %v443_v40, 1  ;;  %v1454_v50 = vsel %vm1436_vm4, %v1194_v41, %v1453_v42  ;;  %v449_v53 = vrot.slane %v448_v44, 2  ;;  %v461_v54 = vrot.slane %v460_v48, 4  ;;  %v180_v41 = vld [vmem:[%s2429_s19 + $0x108] sm:$0xff] }
  0x45   : > { %v1196_v55 = vmul.f32 0.25, %v438_v45  ;;  %v1455_v56 = vsel %vm1438_vm5, %v1195_v46, %v1454_v50  ;;  %v455_v57 = vadd.f32 %v454_v47, %v453_v39  ;;  %v467_v58 = vsel %vm277_vm0, %v174_v43, 0.0  ;;  %v181_v50 = vld [vmem:[%s2429_s19 + $0x110] sm:$0xff] }
  0x46   : > { %v445_v59 = vadd.f32 %v444_v49, %v443_v40  ;;  %v450_v61 = vadd.f32 %v449_v53, %v448_v44  ;;  %v462_v62 = vadd.f32 %v461_v54, %v460_v48  ;;  %v468_v63 = vrot.slane %v467_v58, 4 }
  0x47   : > { %v1456_v0 = vsel %vm1440_vm6, %v1196_v55, %v1455_v56  ;;  %v456_v1 = vrot.slane %v455_v57, 2  ;;  %v474_v2 = vsel %vm277_vm0, %v175_v51, 0.0  ;;  %v481_v3 = vsel %vm277_vm0, %v176_v52, 0.0 }
  0x48   : > { %v1197_v4 = vmul.f32 0.25, %v445_v59  ;;  %v451_v5 = vrot.slane %v450_v61, 1  ;;  %v463_v6 = vrot.slane %v462_v62, 2  ;;  %v469_v7 = vadd.f32 %v468_v63, %v467_v58  ;;  %v182_v58 = vld [vmem:[%s2429_s19 + $0x118] sm:$0xff]  ;;  %v183_v59 = vld [vmem:[%s2429_s19 + $0x120] sm:$0xff] }
  0x49   : > { %v457_v9 = vadd.f32 %v456_v1, %v455_v57  ;;  %v475_v10 = vrot.slane %v474_v2, 4  ;;  %v482_v11 = vrot.slane %v481_v3, 4  ;;  %v488_v12 = vsel %vm277_vm0, %v177_v60, 0.0 }
  0x4a   : > { %v1457_v13 = vsel %vm1442_vm7, %v1197_v4, %v1456_v0  ;;  %v452_v14 = vadd.f32 %v451_v5, %v450_v61  ;;  %v464_v15 = vadd.f32 %v463_v6, %v462_v62  ;;  %v470_v16 = vrot.slane %v469_v7, 2 }
  0x4b   : > { %2262 = vmatprep.mubr.msk.f32.mxu0 %vm277_vm0, %v1457_v13  ;;  %v458_v17 = vrot.slane %v457_v9, 1  ;;  %v476_v18 = vadd.f32 %v475_v10, %v474_v2  ;;  %v483_v19 = vadd.f32 %v482_v11, %v481_v3  ;;  %v489_v20 = vrot.slane %v488_v12, 4 }
  0x4c   : > { %v465_v22 = vrot.slane %v464_v15, 1  ;;  %v471_v23 = vadd.f32 %v470_v16, %v469_v7  ;;  %v495_v24 = vsel %vm277_vm0, %v178_v8, 0.0  ;;  %v1198_v25 = vmul.f32 0.25, %v452_v14  ;;  %v184_v8 = vld [vmem:[%s2429_s19 + $0x128] sm:$0xff]  ;;  %v185_v16 = vld [vmem:[%s2429_s19 + $0x130] sm:$0xff] }
  0x4d   : > { %v459_v26 = vadd.f32 %v458_v17, %v457_v9  ;;  %v477_v27 = vrot.slane %v476_v18, 2  ;;  %v484_v28 = vrot.slane %v483_v19, 2  ;;  %v490_v29 = vadd.f32 %v489_v20, %v488_v12  ;;  %v186_v17 = vld [vmem:[%s2429_s19 + $0x138] sm:$0xff] }
  0x4e   : > { %v466_v30 = vadd.f32 %v465_v22, %v464_v15  ;;  %v472_v31 = vrot.slane %v471_v23, 1  ;;  %v496_v32 = vrot.slane %v495_v24, 4  ;;  %v502_v33 = vsel %vm277_vm0, %v179_v21, 0.0 }
  0x4f   : > { %v478_v34 = vadd.f32 %v477_v27, %v476_v18  ;;  %v485_v35 = vadd.f32 %v484_v28, %v483_v19  ;;  %v491_v36 = vrot.slane %v490_v29, 2  ;;  %v1199_v37 = vmul.f32 0.25, %v459_v26 }
  0x50   : > { %v473_v38 = vadd.f32 %v472_v31, %v471_v23  ;;  %v497_v39 = vadd.f32 %v496_v32, %v495_v24  ;;  %v1200_v40 = vmul.f32 0.25, %v466_v30  ;;  %v503_v42 = vrot.slane %v502_v33, 4 }
  0x51   : > { %v479_v43 = vrot.slane %v478_v34, 1  ;;  %v486_v44 = vrot.slane %v485_v35, 1  ;;  %v492_v45 = vadd.f32 %v491_v36, %v490_v29  ;;  %v1458_v46 = vsel %vm1430_vm1, %v1199_v37, %v1198_v25  ;;  %v187_v37 = vld [vmem:[%s2429_s19 + $0x140] sm:$0xff] }
  0x52   : > { %v498_v47 = vrot.slane %v497_v39, 2  ;;  %v1201_v48 = vmul.f32 0.25, %v473_v38  ;;  %v1459_v49 = vsel %vm1432_vm2, %v1200_v40, %v1458_v46  ;;  %v504_v51 = vadd.f32 %v503_v42, %v502_v33 }
  0x53   : > { %v480_v52 = vadd.f32 %v479_v43, %v478_v34  ;;  %v487_v53 = vadd.f32 %v486_v44, %v485_v35  ;;  %v493_v54 = vrot.slane %v492_v45, 1  ;;  %v509_v55 = vsel %vm277_vm0, %v180_v41, 0.0 }
  0x54   : > { %v499_v56 = vadd.f32 %v498_v47, %v497_v39  ;;  %v1460_v57 = vsel %vm1434_vm3, %v1201_v48, %v1459_v49  ;;  %v505_v60 = vrot.slane %v504_v51, 2  ;;  %v510_v61 = vrot.slane %v509_v55, 4 }
  0x55   : > { %v494_v62 = vadd.f32 %v493_v54, %v492_v45  ;;  %v1202_v63 = vmul.f32 0.25, %v480_v52  ;;  %v1203_v0 = vmul.f32 0.25, %v487_v53  ;;  %v516_v1 = vsel %vm277_vm0, %v181_v50, 0.0  ;;  %v188_v54 = vld [vmem:[%s2429_s19 + $0x148] sm:$0xff] }
  0x56   : > { %v500_v2 = vrot.slane %v499_v56, 1  ;;  %v506_v3 = vadd.f32 %v505_v60, %v504_v51  ;;  %v511_v4 = vadd.f32 %v510_v61, %v509_v55  ;;  %v517_v5 = vrot.slane %v516_v1, 4 }
  0x57   : > { %v1204_v6 = vmul.f32 0.25, %v494_v62  ;;  %v1461_v7 = vsel %vm1436_vm4, %v1202_v63, %v1460_v57  ;;  %v523_v9 = vsel %vm277_vm0, %v182_v58, 0.0  ;;  %v530_v10 = vsel %vm277_vm0, %v183_v59, 0.0 }
  0x58   : > { %v501_v11 = vadd.f32 %v500_v2, %v499_v56  ;;  %v1462_v12 = vsel %vm1438_vm5, %v1203_v0, %v1461_v7  ;;  %v507_v13 = vrot.slane %v506_v3, 1  ;;  %v512_v14 = vrot.slane %v511_v4, 2  ;;  %v190_v2 = vld [vmem:[%s2429_s19 + $0x158] sm:$0xff] }
  0x59   : > { %v1463_v15 = vsel %vm1440_vm6, %v1204_v6, %v1462_v12  ;;  %v518_v18 = vadd.f32 %v517_v5, %v516_v1  ;;  %v524_v19 = vrot.slane %v523_v9, 4  ;;  %v531_v20 = vrot.slane %v530_v10, 4  ;;  %v189_v1 = vld [vmem:[%s2429_s19 + $0x150] sm:$0xff] }
  0x5a   : > { %v1205_v21 = vmul.f32 0.25, %v501_v11  ;;  %v508_v22 = vadd.f32 %v507_v13, %v506_v3  ;;  %v513_v23 = vadd.f32 %v512_v14, %v511_v4  ;;  %v537_v24 = vsel %vm277_vm0, %v184_v8, 0.0 }
  0x5b   : > { %v519_v25 = vrot.slane %v518_v18, 2  ;;  %v525_v26 = vadd.f32 %v524_v19, %v523_v9  ;;  %v532_v27 = vadd.f32 %v531_v20, %v530_v10  ;;  %v538_v28 = vrot.slane %v537_v24, 4 }
  0x5c   : > { %v1464_v29 = vsel %vm1442_vm7, %v1205_v21, %v1463_v15  ;;  %v514_v30 = vrot.slane %v513_v23, 1  ;;  %v544_v31 = vsel %vm277_vm0, %v185_v16, 0.0  ;;  %v551_v32 = vsel %vm277_vm0, %v186_v17, 0.0  ;;  %v191_v15 = vld [vmem:[%s2429_s19 + $0x160] sm:$0xff] }
  0x5d   : > { %2263 = vmatmul.mubr.msk.f32.gmra.mxu0 %vm277_vm0, %v1464_v29  ;;  %v520_v33 = vadd.f32 %v519_v25, %v518_v18  ;;  %v526_v34 = vrot.slane %v525_v26, 2  ;;  %v533_v35 = vrot.slane %v532_v27, 2  ;;  %v539_v36 = vadd.f32 %v538_v28, %v537_v24  ;;  %v193_v24 = vld [vmem:[%s2429_s19 + $0x170] sm:$0xff] }
  0x5e   : > { %v515_v38 = vadd.f32 %v514_v30, %v513_v23  ;;  %v545_v39 = vrot.slane %v544_v31, 4  ;;  %v552_v40 = vrot.slane %v551_v32, 4  ;;  %v1206_v41 = vmul.f32 0.25, %v508_v22  ;;  %v192_v23 = vld [vmem:[%s2429_s19 + $0x168] sm:$0xff] }
  0x5f   : > { %v521_v42 = vrot.slane %v520_v33, 1  ;;  %v527_v43 = vadd.f32 %v526_v34, %v525_v26  ;;  %v534_v44 = vadd.f32 %v533_v35, %v532_v27  ;;  %v540_v45 = vrot.slane %v539_v36, 2 }
  0x60   : > { %v546_v46 = vadd.f32 %v545_v39, %v544_v31  ;;  %v553_v47 = vadd.f32 %v552_v40, %v551_v32  ;;  %v1207_v48 = vmul.f32 0.25, %v515_v38  ;;  %v558_v49 = vsel %vm277_vm0, %v187_v37, 0.0  ;;  %v194_v32 = vld [vmem:[%s2429_s19 + $0x178] sm:$0xff] }
  0x61   : > { %v522_v50 = vadd.f32 %v521_v42, %v520_v33  ;;  %v528_v51 = vrot.slane %v527_v43, 1  ;;  %v535_v52 = vrot.slane %v534_v44, 1  ;;  %v541_v53 = vadd.f32 %v540_v45, %v539_v36 }
  0x62   : > { %v547_v55 = vrot.slane %v546_v46, 2  ;;  %v554_v56 = vrot.slane %v553_v47, 2  ;;  %v1465_v57 = vsel %vm1430_vm1, %v1207_v48, %v1206_v41  ;;  %v559_v58 = vrot.slane %v558_v49, 4 }
  0x63   : > { %v529_v59 = vadd.f32 %v528_v51, %v527_v43  ;;  %v536_v60 = vadd.f32 %v535_v52, %v534_v44  ;;  %v542_v61 = vrot.slane %v541_v53, 1  ;;  %v1208_v62 = vmul.f32 0.25, %v522_v50 }
  0x64   : > { %v548_v63 = vadd.f32 %v547_v55, %v546_v46  ;;  %v555_v0 = vadd.f32 %v554_v56, %v553_v47  ;;  %v560_v3 = vadd.f32 %v559_v58, %v558_v49  ;;  %v565_v4 = vsel %vm277_vm0, %v188_v54, 0.0 }
  0x65   : > { %v543_v5 = vadd.f32 %v542_v61, %v541_v53  ;;  %v1209_v6 = vmul.f32 0.25, %v529_v59  ;;  %v1210_v7 = vmul.f32 0.25, %v536_v60  ;;  %v1466_v8 = vsel %vm1432_vm2, %v1208_v62, %v1465_v57  ;;  %v195_v53 = vld [vmem:[%s2429_s19 + $0x180] sm:$0xff] }
  0x66   : > { %v549_v9 = vrot.slane %v548_v63, 1  ;;  %v556_v10 = vrot.slane %v555_v0, 1  ;;  %v561_v11 = vrot.slane %v560_v3, 2  ;;  %v566_v12 = vrot.slane %v565_v4, 4 }
  0x67   : > { %v1211_v13 = vmul.f32 0.25, %v543_v5  ;;  %v1467_v14 = vsel %vm1434_vm3, %v1209_v6, %v1466_v8  ;;  %v572_v16 = vsel %vm277_vm0, %v189_v1, 0.0  ;;  %v579_v17 = vsel %vm277_vm0, %v190_v2, 0.0 }
  0x68   : > { %v550_v18 = vadd.f32 %v549_v9, %v548_v63  ;;  %v557_v19 = vadd.f32 %v556_v10, %v555_v0  ;;  %v1468_v20 = vsel %vm1436_vm4, %v1210_v7, %v1467_v14  ;;  %v562_v21 = vadd.f32 %v561_v11, %v560_v3  ;;  %v196_v9 = vld [vmem:[%s2429_s19 + $0x188] sm:$0xff]  ;;  %v197_v10 = vld [vmem:[%s2429_s19 + $0x190] sm:$0xff] }
  0x69   : > { %v1469_v22 = vsel %vm1438_vm5, %v1211_v13, %v1468_v20  ;;  %v567_v25 = vadd.f32 %v566_v12, %v565_v4  ;;  %v573_v26 = vrot.slane %v572_v16, 4  ;;  %v580_v27 = vrot.slane %v579_v17, 4 }
  0x6a   : > { %v1212_v28 = vmul.f32 0.25, %v550_v18  ;;  %v1213_v29 = vmul.f32 0.25, %v557_v19  ;;  %v563_v30 = vrot.slane %v562_v21, 1  ;;  %v586_v31 = vsel %vm277_vm0, %v191_v15, 0.0 }
  0x6b   : > { %v568_v33 = vrot.slane %v567_v25, 2  ;;  %v574_v34 = vadd.f32 %v573_v26, %v572_v16  ;;  %v581_v35 = vadd.f32 %v580_v27, %v579_v17  ;;  %v587_v36 = vrot.slane %v586_v31, 4 }
  0x6c   : > { %v1470_v37 = vsel %vm1440_vm6, %v1212_v28, %v1469_v22  ;;  %v564_v38 = vadd.f32 %v563_v30, %v562_v21  ;;  %v593_v39 = vsel %vm277_vm0, %v192_v23, 0.0  ;;  %v600_v40 = vsel %vm277_vm0, %v193_v24, 0.0  ;;  %v198_v22 = vld [vmem:[%s2429_s19 + $0x198] sm:$0xff]  ;;  %v199_v30 = vld [vmem:[%s2429_s19 + $0x1a0] sm:$0xff] }
  0x6d   : > { %v1471_v41 = vsel %vm1442_vm7, %v1213_v29, %v1470_v37  ;;  %v569_v42 = vadd.f32 %v568_v33, %v567_v25  ;;  %v575_v43 = vrot.slane %v574_v34, 2  ;;  %v582_v44 = vrot.slane %v581_v35, 2 }
  0x6e   : > { %2265 = vmatprep.mubr.msk.f32.mxu0 %vm277_vm0, %v1471_v41  ;;  %v588_v45 = vadd.f32 %v587_v36, %v586_v31  ;;  %v594_v46 = vrot.slane %v593_v39, 4  ;;  %v601_v47 = vrot.slane %v600_v40, 4  ;;  %v607_v48 = vsel %vm277_vm0, %v194_v32, 0.0  ;;  %v200_v31 = vld [vmem:[%s2429_s19 + $0x1a8] sm:$0xff] }
  0x6f   : > { %v570_v49 = vrot.slane %v569_v42, 1  ;;  %v576_v50 = vadd.f32 %v575_v43, %v574_v34  ;;  %v583_v51 = vadd.f32 %v582_v44, %v581_v35  ;;  %v608_v52 = vrot.slane %v607_v48, 4  ;;  %v201_v44 = vld [vmem:[%s2429_s19 + $0x1b0] sm:$0xff] }
  0x70   : > { %v589_v54 = vrot.slane %v588_v45, 2  ;;  %v595_v55 = vadd.f32 %v594_v46, %v593_v39  ;;  %v602_v56 = vadd.f32 %v601_v47, %v600_v40  ;;  %v1214_v57 = vmul.f32 0.25, %v564_v38 }
  0x71   : > { %v571_v58 = vadd.f32 %v570_v49, %v569_v42  ;;  %v577_v59 = vrot.slane %v576_v50, 1  ;;  %v584_v60 = vrot.slane %v583_v51, 1  ;;  %v609_v61 = vadd.f32 %v608_v52, %v607_v48 }
  0x72   : > { %v590_v62 = vadd.f32 %v589_v54, %v588_v45  ;;  %v596_v63 = vrot.slane %v595_v55, 2  ;;  %v603_v0 = vrot.slane %v602_v56, 2  ;;  %v614_v1 = vsel %vm277_vm0, %v195_v53, 0.0  ;;  %v202_v53 = vld [vmem:[%s2429_s19 + $0x1b8] sm:$0xff] }
  0x73   : > { %v578_v2 = vadd.f32 %v577_v59, %v576_v50  ;;  %v585_v3 = vadd.f32 %v584_v60, %v583_v51  ;;  %v610_v4 = vrot.slane %v609_v61, 2  ;;  %v1215_v5 = vmul.f32 0.25, %v571_v58 }
  0x74   : > { %v591_v6 = vrot.slane %v590_v62, 1  ;;  %v597_v7 = vadd.f32 %v596_v63, %v595_v55  ;;  %v604_v8 = vadd.f32 %v603_v0, %v602_v56  ;;  %v615_v11 = vrot.slane %v614_v1, 4 }
  0x75   : > { %v611_v12 = vadd.f32 %v610_v4, %v609_v61  ;;  %v1216_v13 = vmul.f32 0.25, %v578_v2  ;;  %v1217_v14 = vmul.f32 0.25, %v585_v3  ;;  %v1472_v15 = vsel %vm1430_vm1, %v1215_v5, %v1214_v57 }
  0x76   : > { %v592_v16 = vadd.f32 %v591_v6, %v590_v62  ;;  %v598_v17 = vrot.slane %v597_v7, 1  ;;  %v605_v18 = vrot.slane %v604_v8, 1  ;;  %v616_v19 = vadd.f32 %v615_v11, %v614_v1  ;;  %v203_v1 = vld [vmem:[%s2429_s19 + $0x1c0] sm:$0xff] }
  0x77   : > { %v612_v20 = vrot.slane %v611_v12, 1  ;;  %v1473_v21 = vsel %vm1432_vm2, %v1216_v13, %v1472_v15  ;;  %v621_v23 = vsel %vm277_vm0, %v196_v9, 0.0  ;;  %v628_v24 = vsel %vm277_vm0, %v197_v10, 0.0 }
  0x78   : > { %v599_v25 = vadd.f32 %v598_v17, %v597_v7  ;;  %v606_v26 = vadd.f32 %v605_v18, %v604_v8  ;;  %v1218_v27 = vmul.f32 0.25, %v592_v16  ;;  %v1474_v28 = vsel %vm1434_vm3, %v1217_v14, %v1473_v21  ;;  %v204_v18 = vld [vmem:[%s2429_s19 + $0x1c8] sm:$0xff] }
  0x79   : > { %v613_v29 = vadd.f32 %v612_v20, %v611_v12  ;;  %v617_v32 = vrot.slane %v616_v19, 2  ;;  %v622_v33 = vrot.slane %v621_v23, 4  ;;  %v629_v34 = vrot.slane %v628_v24, 4 }
  0x7a   : > { %v1219_v35 = vmul.f32 0.25, %v599_v25  ;;  %v1220_v36 = vmul.f32 0.25, %v606_v26  ;;  %v1475_v37 = vsel %vm1436_vm4, %v1218_v27, %v1474_v28  ;;  %v635_v38 = vsel %vm277_vm0, %v198_v22, 0.0 }
  0x7b   : > { %v1221_v39 = vmul.f32 0.25, %v613_v29  ;;  %v618_v40 = vadd.f32 %v617_v32, %v616_v19  ;;  %v623_v41 = vadd.f32 %v622_v33, %v621_v23  ;;  %v630_v42 = vadd.f32 %v629_v34, %v628_v24 }
  0x7c   : > { %v1476_v43 = vsel %vm1438_vm5, %v1219_v35, %v1475_v37  ;;  %v636_v45 = vrot.slane %v635_v38, 4  ;;  %v642_v46 = vsel %vm277_vm0, %v199_v30, 0.0  ;;  %v649_v47 = vsel %vm277_vm0, %v200_v31, 0.0  ;;  %v205_v35 = vld [vmem:[%s2429_s19 + $0x1d0] sm:$0xff] }
  0x7d   : > { %v1477_v48 = vsel %vm1440_vm6, %v1220_v36, %v1476_v43  ;;  %v619_v49 = vrot.slane %v618_v40, 1  ;;  %v624_v50 = vrot.slane %v623_v41, 2  ;;  %v631_v51 = vrot.slane %v630_v42, 2 }
  0x7e   : > { %v1478_v52 = vsel %vm1442_vm7, %v1221_v39, %v1477_v48  ;;  %v637_v54 = vadd.f32 %v636_v45, %v635_v38  ;;  %v643_v55 = vrot.slane %v642_v46, 4  ;;  %v650_v56 = vrot.slane %v649_v47, 4  ;;  %v206_v38 = vld [vmem:[%s2429_s19 + $0x1d8] sm:$0xff] }
  0x7f   : > { %2266 = vmatmul.mubr.msk.f32.gmra.mxu0 %vm277_vm0, %v1478_v52  ;;  %v620_v57 = vadd.f32 %v619_v49, %v618_v40  ;;  %v625_v58 = vadd.f32 %v624_v50, %v623_v41  ;;  %v632_v59 = vadd.f32 %v631_v51, %v630_v42  ;;  %v656_v60 = vsel %vm277_vm0, %v201_v44, 0.0 }
  0x80   : > { %v638_v61 = vrot.slane %v637_v54, 2  ;;  %v644_v62 = vadd.f32 %v643_v55, %v642_v46  ;;  %v651_v63 = vadd.f32 %v650_v56, %v649_v47  ;;  %v657_v0 = vrot.slane %v656_v60, 4  ;;  %v207_v46 = vld [vmem:[%s2429_s19 + $0x1e0] sm:$0xff]  ;;  %v208_v56 = vld [vmem:[%s2429_s19 + $0x1e8] sm:$0xff] }
  0x81   : > { %v626_v2 = vrot.slane %v625_v58, 1  ;;  %v633_v3 = vrot.slane %v632_v59, 1  ;;  %v663_v4 = vsel %vm277_vm0, %v202_v53, 0.0  ;;  %v1222_v5 = vmul.f32 0.25, %v620_v57  ;;  %v209_v57 = vld [vmem:[%s2429_s19 + $0x1f0] sm:$0xff] }
  0x82   : > { %v639_v6 = vadd.f32 %v638_v61, %v637_v54  ;;  %v645_v7 = vrot.slane %v644_v62, 2  ;;  %v652_v8 = vrot.slane %v651_v63, 2  ;;  %v658_v9 = vadd.f32 %v657_v0, %v656_v60 }
  0x83   : > { %v627_v10 = vadd.f32 %v626_v2, %v625_v58  ;;  %v634_v11 = vadd.f32 %v633_v3, %v632_v59  ;;  %v664_v12 = vrot.slane %v663_v4, 4  ;;  %v670_v13 = vsel %vm277_vm0, %v203_v1, 0.0  ;;  %v210_v1 = vld [vmem:[%s2429_s19 + $0x1f8] sm:$0xff] }
  0x84   : > { %v640_v14 = vrot.slane %v639_v6, 1  ;;  %v646_v15 = vadd.f32 %v645_v7, %v644_v62  ;;  %v653_v16 = vadd.f32 %v652_v8, %v651_v63  ;;  %v659_v17 = vrot.slane %v658_v9, 2 }
  0x85   : > { %v665_v19 = vadd.f32 %v664_v12, %v663_v4  ;;  %v1223_v20 = vmul.f32 0.25, %v627_v10  ;;  %v1224_v21 = vmul.f32 0.25, %v634_v11  ;;  %v671_v22 = vrot.slane %v670_v13, 4 }
  0x86   : > { %v641_v23 = vadd.f32 %v640_v14, %v639_v6  ;;  %v647_v24 = vrot.slane %v646_v15, 1  ;;  %v654_v25 = vrot.slane %v653_v16, 1  ;;  %v660_v26 = vadd.f32 %v659_v17, %v658_v9 }
  0x87   : > { %v666_v27 = vrot.slane %v665_v19, 2  ;;  %v1479_v28 = vsel %vm1430_vm1, %v1223_v20, %v1222_v5  ;;  %v672_v29 = vadd.f32 %v671_v22, %v670_v13  ;;  %v677_v30 = vsel %vm277_vm0, %v204_v18, 0.0 }
  0x88   : > { %v648_v31 = vadd.f32 %v647_v24, %v646_v15  ;;  %v655_v32 = vadd.f32 %v654_v25, %v653_v16  ;;  %v661_v33 = vrot.slane %v660_v26, 1  ;;  %v1225_v34 = vmul.f32 0.25, %v641_v23 }
  0x89   : > { %v667_v36 = vadd.f32 %v666_v27, %v665_v19  ;;  %v1480_v37 = vsel %vm1432_vm2, %v1224_v21, %v1479_v28  ;;  %v673_v39 = vrot.slane %v672_v29, 2  ;;  %v678_v40 = vrot.slane %v677_v30, 4  ;;  %v211_v21 = vld [vmem:[%s2429_s19 + $0x200] sm:$0xff] }
  0x8a   : > { %v662_v41 = vadd.f32 %v661_v33, %v660_v26  ;;  %v1226_v42 = vmul.f32 0.25, %v648_v31  ;;  %v1227_v43 = vmul.f32 0.25, %v655_v32  ;;  %v1481_v44 = vsel %vm1434_vm3, %v1225_v34, %v1480_v37  ;;  %v212_v33 = vld [vmem:[%s2429_s19 + $0x208] sm:$0xff] }
  0x8b   : > { %v668_v45 = vrot.slane %v667_v36, 1  ;;  %v674_v47 = vadd.f32 %v673_v39, %v672_v29  ;;  %v679_v48 = vadd.f32 %v678_v40, %v677_v30  ;;  %v684_v49 = vsel %vm277_vm0, %v205_v35, 0.0 }
  0x8c   : > { %v1228_v50 = vmul.f32 0.25, %v662_v41  ;;  %v1482_v51 = vsel %vm1436_vm4, %v1226_v42, %v1481_v44  ;;  %v685_v52 = vrot.slane %v684_v49, 4  ;;  %v691_v53 = vsel %vm277_vm0, %v206_v38, 0.0 }
  0x8d   : > { %v669_v54 = vadd.f32 %v668_v45, %v667_v36  ;;  %v1483_v55 = vsel %vm1438_vm5, %v1227_v43, %v1482_v51  ;;  %v675_v58 = vrot.slane %v674_v47, 1  ;;  %v680_v59 = vrot.slane %v679_v48, 2 }
  0x8e   : > { %v1484_v60 = vsel %vm1440_vm6, %v1228_v50, %v1483_v55  ;;  %v686_v61 = vadd.f32 %v685_v52, %v684_v49  ;;  %v692_v62 = vrot.slane %v691_v53, 4  ;;  %v698_v63 = vsel %vm277_vm0, %v207_v46, 0.0  ;;  %v213_v46 = vld [vmem:[%s2429_s19 + $0x210] sm:$0xff]  ;;  %v214_v55 = vld [vmem:[%s2429_s19 + $0x218] sm:$0xff] }
  0x8f   : > { %v1229_v0 = vmul.f32 0.25, %v669_v54  ;;  %v676_v2 = vadd.f32 %v675_v58, %v674_v47  ;;  %v681_v3 = vadd.f32 %v680_v59, %v679_v48  ;;  %v699_v4 = vrot.slane %v698_v63, 4 }
  0x90   : > { %v687_v5 = vrot.slane %v686_v61, 2  ;;  %v693_v6 = vadd.f32 %v692_v62, %v691_v53  ;;  %v705_v7 = vsel %vm277_vm0, %v208_v56, 0.0  ;;  %v712_v8 = vsel %vm277_vm0, %v209_v57, 0.0 }
  0x91   : > { %v1485_v9 = vsel %vm1442_vm7, %v1229_v0, %v1484_v60  ;;  %v682_v10 = vrot.slane %v681_v3, 1  ;;  %v700_v11 = vadd.f32 %v699_v4, %v698_v63  ;;  %v706_v12 = vrot.slane %v705_v7, 4  ;;  %v215_v0 = vld [vmem:[%s2429_s19 + $0x220] sm:$0xff] }
  0x92   : > { %2268 = vmatprep.mubr.msk.f32.mxu0 %vm277_vm0, %v1485_v9  ;;  %v688_v13 = vadd.f32 %v687_v5, %v686_v61  ;;  %v694_v14 = vrot.slane %v693_v6, 2  ;;  %v713_v15 = vrot.slane %v712_v8, 4  ;;  %v719_v16 = vsel %vm277_vm0, %v210_v1, 0.0  ;;  %v217_v9 = vld [vmem:[%s2429_s19 + $0x230] sm:$0xff] }
  0x93   : > { %v683_v17 = vadd.f32 %v682_v10, %v681_v3  ;;  %v701_v18 = vrot.slane %v700_v11, 2  ;;  %v707_v19 = vadd.f32 %v706_v12, %v705_v7  ;;  %v720_v20 = vrot.slane %v719_v16, 4 }
  0x94   : > { %v689_v22 = vrot.slane %v688_v13, 1  ;;  %v695_v23 = vadd.f32 %v694_v14, %v693_v6  ;;  %v714_v24 = vadd.f32 %v713_v15, %v712_v8  ;;  %v1230_v25 = vmul.f32 0.25, %v676_v2  ;;  %v216_v8 = vld [vmem:[%s2429_s19 + $0x228] sm:$0xff] }
  0x95   : > { %v702_v26 = vadd.f32 %v701_v18, %v700_v11  ;;  %v708_v27 = vrot.slane %v707_v19, 2  ;;  %v721_v28 = vadd.f32 %v720_v20, %v719_v16  ;;  %v1231_v29 = vmul.f32 0.25, %v683_v17  ;;  %v218_v17 = vld [vmem:[%s2429_s19 + $0x238] sm:$0xff] }
  0x96   : > { %v690_v30 = vadd.f32 %v689_v22, %v688_v13  ;;  %v696_v31 = vrot.slane %v695_v23, 1  ;;  %v715_v32 = vrot.slane %v714_v24, 2  ;;  %v726_v34 = vsel %vm277_vm0, %v211_v21, 0.0 }
  0x97   : > { %v703_v35 = vrot.slane %v702_v26, 1  ;;  %v709_v36 = vadd.f32 %v708_v27, %v707_v19  ;;  %v722_v37 = vrot.slane %v721_v28, 2  ;;  %v1486_v38 = vsel %vm1430_vm1, %v1231_v29, %v1230_v25  ;;  %v219_v29 = vld [vmem:[%s2429_s19 + $0x240] sm:$0xff] }
  0x98   : > { %v697_v39 = vadd.f32 %v696_v31, %v695_v23  ;;  %v716_v40 = vadd.f32 %v715_v32, %v714_v24  ;;  %v1232_v41 = vmul.f32 0.25, %v690_v30  ;;  %v727_v42 = vrot.slane %v726_v34, 4 }
  0x99   : > { %v704_v43 = vadd.f32 %v703_v35, %v702_v26  ;;  %v710_v44 = vrot.slane %v709_v36, 1  ;;  %v723_v45 = vadd.f32 %v722_v37, %v721_v28  ;;  %v733_v47 = vsel %vm277_vm0, %v212_v33, 0.0 }
  0x9a   : > { %v717_v48 = vrot.slane %v716_v40, 1  ;;  %v1233_v49 = vmul.f32 0.25, %v697_v39  ;;  %v1487_v50 = vsel %vm1432_vm2, %v1232_v41, %v1486_v38  ;;  %v728_v51 = vadd.f32 %v727_v42, %v726_v34 }
  0x9b   : > { %v711_v52 = vadd.f32 %v710_v44, %v709_v36  ;;  %v724_v53 = vrot.slane %v723_v45, 1  ;;  %v1234_v54 = vmul.f32 0.25, %v704_v43  ;;  %v734_v56 = vrot.slane %v733_v47, 4 }
  0x9c   : > { %v718_v57 = vadd.f32 %v717_v48, %v716_v40  ;;  %v1488_v58 = vsel %vm1434_vm3, %v1233_v49, %v1487_v50  ;;  %v729_v59 = vrot.slane %v728_v51, 2  ;;  %v740_v60 = vsel %vm277_vm0, %v213_v46, 0.0  ;;  %v220_v49 = vld [vmem:[%s2429_s19 + $0x248] sm:$0xff] }
  0x9d   : > { %v725_v61 = vadd.f32 %v724_v53, %v723_v45  ;;  %v1235_v62 = vmul.f32 0.25, %v711_v52  ;;  %v1489_v63 = vsel %vm1436_vm4, %v1234_v54, %v1488_v58  ;;  %v735_v1 = vadd.f32 %v734_v56, %v733_v47 }
  0x9e   : > { %v1236_v2 = vmul.f32 0.25, %v718_v57  ;;  %v730_v3 = vadd.f32 %v729_v59, %v728_v51  ;;  %v741_v4 = vrot.slane %v740_v60, 4  ;;  %v747_v5 = vsel %vm277_vm0, %v214_v55, 0.0 }
  0x9f   : > { %v1237_v6 = vmul.f32 0.25, %v725_v61  ;;  %v1490_v7 = vsel %vm1438_vm5, %v1235_v62, %v1489_v63  ;;  %v736_v10 = vrot.slane %v735_v1, 2  ;;  %v748_v11 = vrot.slane %v747_v5, 4  ;;  %v221_v62 = vld [vmem:[%s2429_s19 + $0x250] sm:$0xff] }
  0xa0   : > { %v1491_v12 = vsel %vm1440_vm6, %v1236_v2, %v1490_v7  ;;  %v731_v13 = vrot.slane %v730_v3, 1  ;;  %v742_v14 = vadd.f32 %v741_v4, %v740_v60  ;;  %v754_v15 = vsel %vm277_vm0, %v215_v0, 0.0  ;;  %v222_v7 = vld [vmem:[%s2429_s19 + $0x258] sm:$0xff] }
  0xa1   : > { %v1492_v16 = vsel %vm1442_vm7, %v1237_v6, %v1491_v12  ;;  %v737_v18 = vadd.f32 %v736_v10, %v735_v1  ;;  %v749_v19 = vadd.f32 %v748_v11, %v747_v5  ;;  %v755_v20 = vrot.slane %v754_v15, 4 }
  0xa2   : > { %2269 = vmatmul.mubr.msk.f32.gmra.mxu0 %vm277_vm0, %v1492_v16  ;;  %v732_v21 = vadd.f32 %v731_v13, %v730_v3  ;;  %v743_v22 = vrot.slane %v742_v14, 2  ;;  %v761_v23 = vsel %vm277_vm0, %v216_v8, 0.0  ;;  %v768_v24 = vsel %vm277_vm0, %v217_v9, 0.0 }
  0xa3   : > { %v738_v25 = vrot.slane %v737_v18, 1  ;;  %v750_v26 = vrot.slane %v749_v19, 2  ;;  %v756_v27 = vadd.f32 %v755_v20, %v754_v15  ;;  %v762_v28 = vrot.slane %v761_v23, 4  ;;  %v223_v15 = vld [vmem:[%s2429_s19 + $0x260] sm:$0xff] }
  0xa4   : > { %v744_v30 = vadd.f32 %v743_v22, %v742_v14  ;;  %v769_v31 = vrot.slane %v768_v24, 4  ;;  %v775_v32 = vsel %vm277_vm0, %v218_v17, 0.0  ;;  %v1238_v33 = vmul.f32 0.25, %v732_v21 }
  0xa5   : > { %v739_v34 = vadd.f32 %v738_v25, %v737_v18  ;;  %v751_v35 = vadd.f32 %v750_v26, %v749_v19  ;;  %v757_v36 = vrot.slane %v756_v27, 2  ;;  %v763_v37 = vadd.f32 %v762_v28, %v761_v23  ;;  %v224_v23 = vld [vmem:[%s2429_s19 + $0x268] sm:$0xff]  ;;  %v226_v25 = vld [vmem:[%s2429_s19 + $0x278] sm:$0xff] }
  0xa6   : > { %v745_v38 = vrot.slane %v744_v30, 1  ;;  %v770_v39 = vadd.f32 %v769_v31, %v768_v24  ;;  %v776_v40 = vrot.slane %v775_v32, 4  ;;  %v782_v41 = vsel %vm277_vm0, %v219_v29, 0.0  ;;  %v225_v24 = vld [vmem:[%s2429_s19 + $0x270] sm:$0xff] }
  0xa7   : > { %v752_v42 = vrot.slane %v751_v35, 1  ;;  %v758_v43 = vadd.f32 %v757_v36, %v756_v27  ;;  %v764_v44 = vrot.slane %v763_v37, 2  ;;  %v1239_v45 = vmul.f32 0.25, %v739_v34 }
  0xa8   : > { %v746_v46 = vadd.f32 %v745_v38, %v744_v30  ;;  %v771_v47 = vrot.slane %v770_v39, 2  ;;  %v777_v48 = vadd.f32 %v776_v40, %v775_v32  ;;  %v783_v50 = vrot.slane %v782_v41, 4 }
  0xa9   : > { %v753_v51 = vadd.f32 %v752_v42, %v751_v35  ;;  %v759_v52 = vrot.slane %v758_v43, 1  ;;  %v765_v53 = vadd.f32 %v764_v44, %v763_v37  ;;  %v1493_v54 = vsel %vm1430_vm1, %v1239_v45, %v1238_v33  ;;  %v227_v45 = vld [vmem:[%s2429_s19 + $0x280] sm:$0xff] }
  0xaa   : > { %v772_v55 = vadd.f32 %v771_v47, %v770_v39  ;;  %v778_v56 = vrot.slane %v777_v48, 2  ;;  %v1240_v57 = vmul.f32 0.25, %v746_v46  ;;  %v784_v58 = vadd.f32 %v783_v50, %v782_v41 }
  0xab   : > { %v760_v59 = vadd.f32 %v759_v52, %v758_v43  ;;  %v766_v60 = vrot.slane %v765_v53, 1  ;;  %v1241_v61 = vmul.f32 0.25, %v753_v51  ;;  %v789_v63 = vsel %vm277_vm0, %v220_v49, 0.0 }
  0xac   : > { %v773_v0 = vrot.slane %v772_v55, 1  ;;  %v779_v1 = vadd.f32 %v778_v56, %v777_v48  ;;  %v1494_v2 = vsel %vm1432_vm2, %v1240_v57, %v1493_v54  ;;  %v785_v3 = vrot.slane %v784_v58, 2 }
  0xad   : > { %v767_v4 = vadd.f32 %v766_v60, %v765_v53  ;;  %v1242_v5 = vmul.f32 0.25, %v760_v59  ;;  %v1495_v6 = vsel %vm1434_vm3, %v1241_v61, %v1494_v2  ;;  %v790_v8 = vrot.slane %v789_v63, 4 }
  0xae   : > { %v774_v9 = vadd.f32 %v773_v0, %v772_v55  ;;  %v780_v10 = vrot.slane %v779_v1, 1  ;;  %v786_v11 = vadd.f32 %v785_v3, %v784_v58  ;;  %v796_v12 = vsel %vm277_vm0, %v221_v62, 0.0 }
  0xaf   : > { %v1243_v13 = vmul.f32 0.25, %v767_v4  ;;  %v1496_v14 = vsel %vm1436_vm4, %v1242_v5, %v1495_v6  ;;  %v791_v16 = vadd.f32 %v790_v8, %v789_v63  ;;  %v797_v17 = vrot.slane %v796_v12, 4 }
  0xb0   : > { %v781_v18 = vadd.f32 %v780_v10, %v779_v1  ;;  %v1244_v19 = vmul.f32 0.25, %v774_v9  ;;  %v787_v20 = vrot.slane %v786_v11, 1  ;;  %v803_v21 = vsel %vm277_vm0, %v222_v7, 0.0  ;;  %v228_v1 = vld [vmem:[%s2429_s19 + $0x288] sm:$0xff]  ;;  %v229_v10 = vld [vmem:[%s2429_s19 + $0x290] sm:$0xff] }
  0xb1   : > { %v1497_v22 = vsel %vm1438_vm5, %v1243_v13, %v1496_v14  ;;  %v792_v26 = vrot.slane %v791_v16, 2  ;;  %v798_v27 = vadd.f32 %v797_v17, %v796_v12  ;;  %v804_v28 = vrot.slane %v803_v21, 4 }
  0xb2   : > { %v1245_v29 = vmul.f32 0.25, %v781_v18  ;;  %v1498_v30 = vsel %vm1440_vm6, %v1244_v19, %v1497_v22  ;;  %v788_v31 = vadd.f32 %v787_v20, %v786_v11  ;;  %v810_v32 = vsel %vm277_vm0, %v223_v15, 0.0  ;;  %v230_v19 = vld [vmem:[%s2429_s19 + $0x298] sm:$0xff] }
  0xb3   : > { %v793_v33 = vadd.f32 %v792_v26, %v791_v16  ;;  %v799_v34 = vrot.slane %v798_v27, 2  ;;  %v805_v35 = vadd.f32 %v804_v28, %v803_v21  ;;  %v811_v36 = vrot.slane %v810_v32, 4  ;;  %v231_v28 = vld [vmem:[%s2429_s19 + $0x2a0] sm:$0xff] }
  0xb4   : > { %v1499_v37 = vsel %vm1442_vm7, %v1245_v29, %v1498_v30  ;;  %v817_v38 = vsel %vm277_vm0, %v224_v23, 0.0  ;;  %v824_v39 = vsel %vm277_vm0, %v225_v24, 0.0  ;;  %v831_v40 = vsel %vm277_vm0, %v226_v25, 0.0 }
  0xb5   : > { %2271 = vmatprep.mubr.msk.f32.mxu0 %vm277_vm0, %v1499_v37  ;;  %v794_v41 = vrot.slane %v793_v33, 1  ;;  %v800_v42 = vadd.f32 %v799_v34, %v798_v27  ;;  %v806_v43 = vrot.slane %v805_v35, 2  ;;  %v812_v44 = vadd.f32 %v811_v36, %v810_v32 }
  0xb6   : > { %v818_v46 = vrot.slane %v817_v38, 4  ;;  %v825_v47 = vrot.slane %v824_v39, 4  ;;  %v832_v48 = vrot.slane %v831_v40, 4  ;;  %v1246_v49 = vmul.f32 0.25, %v788_v31  ;;  %v232_v31 = vld [vmem:[%s2429_s19 + $0x2a8] sm:$0xff] }
  0xb7   : > { %v795_v50 = vadd.f32 %v794_v41, %v793_v33  ;;  %v801_v51 = vrot.slane %v800_v42, 1  ;;  %v807_v52 = vadd.f32 %v806_v43, %v805_v35  ;;  %v813_v53 = vrot.slane %v812_v44, 2 }
  0xb8   : > { %v819_v54 = vadd.f32 %v818_v46, %v817_v38  ;;  %v826_v55 = vadd.f32 %v825_v47, %v824_v39  ;;  %v833_v56 = vadd.f32 %v832_v48, %v831_v40  ;;  %v838_v57 = vsel %vm277_vm0, %v227_v45, 0.0  ;;  %v233_v39 = vld [vmem:[%s2429_s19 + $0x2b0] sm:$0xff] }
  0xb9   : > { %v802_v58 = vadd.f32 %v801_v51, %v800_v42  ;;  %v808_v59 = vrot.slane %v807_v52, 1  ;;  %v814_v60 = vadd.f32 %v813_v53, %v812_v44  ;;  %v1247_v61 = vmul.f32 0.25, %v795_v50 }
  0xba   : > { %v820_v62 = vrot.slane %v819_v54, 2  ;;  %v827_v63 = vrot.slane %v826_v55, 2  ;;  %v834_v0 = vrot.slane %v833_v56, 2  ;;  %v839_v2 = vrot.slane %v838_v57, 4 }
  0xbb   : > { %v809_v3 = vadd.f32 %v808_v59, %v807_v52  ;;  %v815_v4 = vrot.slane %v814_v60, 1  ;;  %v1248_v5 = vmul.f32 0.25, %v802_v58  ;;  %v1500_v6 = vsel %vm1430_vm1, %v1247_v61, %v1246_v49  ;;  %v234_v49 = vld [vmem:[%s2429_s19 + $0x2b8] sm:$0xff]  ;;  %v235_v61 = vld [vmem:[%s2429_s19 + $0x2c0] sm:$0xff] }
  0xbc   : > { %v821_v7 = vadd.f32 %v820_v62, %v819_v54  ;;  %v828_v8 = vadd.f32 %v827_v63, %v826_v55  ;;  %v835_v9 = vadd.f32 %v834_v0, %v833_v56  ;;  %v840_v11 = vadd.f32 %v839_v2, %v838_v57 }
  0xbd   : > { %v816_v12 = vadd.f32 %v815_v4, %v814_v60  ;;  %v1249_v13 = vmul.f32 0.25, %v809_v3  ;;  %v1501_v14 = vsel %vm1432_vm2, %v1248_v5, %v1500_v6  ;;  %v845_v15 = vsel %vm277_vm0, %v228_v1, 0.0 }
  0xbe   : > { %v822_v16 = vrot.slane %v821_v7, 1  ;;  %v829_v17 = vrot.slane %v828_v8, 1  ;;  %v836_v18 = vrot.slane %v835_v9, 1  ;;  %v841_v20 = vrot.slane %v840_v11, 2 }
  0xbf   : > { %v1250_v21 = vmul.f32 0.25, %v816_v12  ;;  %v1502_v22 = vsel %vm1434_vm3, %v1249_v13, %v1501_v14  ;;  %v846_v23 = vrot.slane %v845_v15, 4  ;;  %v852_v24 = vsel %vm277_vm0, %v229_v10, 0.0 }
  0xc0   : > { %v823_v25 = vadd.f32 %v822_v16, %v821_v7  ;;  %v830_v26 = vadd.f32 %v829_v17, %v828_v8  ;;  %v837_v27 = vadd.f32 %v836_v18, %v835_v9  ;;  %v842_v29 = vadd.f32 %v841_v20, %v840_v11  ;;  %v236_v17 = vld [vmem:[%s2429_s19 + $0x2c8] sm:$0xff] }
  0xc1   : > { %v1503_v30 = vsel %vm1436_vm4, %v1250_v21, %v1502_v22  ;;  %v847_v32 = vadd.f32 %v846_v23, %v845_v15  ;;  %v853_v33 = vrot.slane %v852_v24, 4  ;;  %v859_v34 = vsel %vm277_vm0, %v230_v19, 0.0 }
  0xc2   : > { %v1251_v35 = vmul.f32 0.25, %v823_v25  ;;  %v1252_v36 = vmul.f32 0.25, %v830_v26  ;;  %v1253_v37 = vmul.f32 0.25, %v837_v27  ;;  %v843_v38 = vrot.slane %v842_v29, 1  ;;  %v237_v26 = vld [vmem:[%s2429_s19 + $0x2d0] sm:$0xff] }
  0xc3   : > { %v848_v40 = vrot.slane %v847_v32, 2  ;;  %v854_v41 = vadd.f32 %v853_v33, %v852_v24  ;;  %v860_v42 = vrot.slane %v859_v34, 4  ;;  %v866_v43 = vsel %vm277_vm0, %v231_v28, 0.0 }
  0xc4   : > { %v1504_v44 = vsel %vm1438_vm5, %v1251_v35, %v1503_v30  ;;  %v844_v45 = vadd.f32 %v843_v38, %v842_v29  ;;  %v867_v46 = vrot.slane %v866_v43, 4  ;;  %v873_v47 = vsel %vm277_vm0, %v232_v31, 0.0  ;;  %v238_v35 = vld [vmem:[%s2429_s19 + $0x2d8] sm:$0xff] }
  0xc5   : > { %v1505_v48 = vsel %vm1440_vm6, %v1252_v36, %v1504_v44  ;;  %v849_v50 = vadd.f32 %v848_v40, %v847_v32  ;;  %v855_v51 = vrot.slane %v854_v41, 2  ;;  %v861_v52 = vadd.f32 %v860_v42, %v859_v34  ;;  %v239_v44 = vld [vmem:[%s2429_s19 + $0x2e0] sm:$0xff] }
  0xc6   : > { %v1506_v53 = vsel %vm1442_vm7, %v1253_v37, %v1505_v48  ;;  %v868_v54 = vadd.f32 %v867_v46, %v866_v43  ;;  %v874_v55 = vrot.slane %v873_v47, 4  ;;  %v880_v56 = vsel %vm277_vm0, %v233_v39, 0.0 }
  0xc7   : > { %2272 = vmatmul.mubr.msk.f32.gmra.mxu0 %vm277_vm0, %v1506_v53  ;;  %v850_v57 = vrot.slane %v849_v50, 1  ;;  %v856_v58 = vadd.f32 %v855_v51, %v854_v41  ;;  %v862_v59 = vrot.slane %v861_v52, 2  ;;  %v881_v60 = vrot.slane %v880_v56, 4  ;;  %v241_v53 = vld [vmem:[%s2429_s19 + $0x2f0] sm:$0xff] }
  0xc8   : > { %v869_v62 = vrot.slane %v868_v54, 2  ;;  %v875_v63 = vadd.f32 %v874_v55, %v873_v47  ;;  %v887_v0 = vsel %vm277_vm0, %v234_v49, 0.0  ;;  %v1254_v1 = vmul.f32 0.25, %v844_v45 }
  0xc9   : > { %v851_v2 = vadd.f32 %v850_v57, %v849_v50  ;;  %v857_v3 = vrot.slane %v856_v58, 1  ;;  %v863_v4 = vadd.f32 %v862_v59, %v861_v52  ;;  %v882_v5 = vadd.f32 %v881_v60, %v880_v56  ;;  %v240_v52 = vld [vmem:[%s2429_s19 + $0x2e8] sm:$0xff] }
  0xca   : > { %v870_v6 = vadd.f32 %v869_v62, %v868_v54  ;;  %v876_v7 = vrot.slane %v875_v63, 2  ;;  %v888_v8 = vrot.slane %v887_v0, 4  ;;  %v894_v9 = vsel %vm277_vm0, %v235_v61, 0.0  ;;  %v242_v61 = vld [vmem:[%s2429_s19 + $0x2f8] sm:$0xff] }
  0xcb   : > { %v858_v10 = vadd.f32 %v857_v3, %v856_v58  ;;  %v864_v11 = vrot.slane %v863_v4, 1  ;;  %v883_v12 = vrot.slane %v882_v5, 2  ;;  %v1255_v13 = vmul.f32 0.25, %v851_v2 }
  0xcc   : > { %v871_v14 = vrot.slane %v870_v6, 1  ;;  %v877_v15 = vadd.f32 %v876_v7, %v875_v63  ;;  %v889_v16 = vadd.f32 %v888_v8, %v887_v0  ;;  %v895_v18 = vrot.slane %v894_v9, 4 }
  0xcd   : > { %v865_v19 = vadd.f32 %v864_v11, %v863_v4  ;;  %v884_v20 = vadd.f32 %v883_v12, %v882_v5  ;;  %v1256_v21 = vmul.f32 0.25, %v858_v10  ;;  %v1507_v22 = vsel %vm1430_vm1, %v1255_v13, %v1254_v1 }
  0xce   : > { %v872_v23 = vadd.f32 %v871_v14, %v870_v6  ;;  %v878_v24 = vrot.slane %v877_v15, 1  ;;  %v890_v25 = vrot.slane %v889_v16, 2  ;;  %v896_v27 = vadd.f32 %v895_v18, %v894_v9 }
  0xcf   : > { %v885_v28 = vrot.slane %v884_v20, 1  ;;  %v1257_v29 = vmul.f32 0.25, %v865_v19  ;;  %v1508_v30 = vsel %vm1432_vm2, %v1256_v21, %v1507_v22  ;;  %v901_v31 = vsel %vm277_vm0, %v236_v17, 0.0  ;;  %v243_v17 = vld [vmem:[%s2429_s19 + $0x300] sm:$0xff] }
  0xd0   : > { %v879_v32 = vadd.f32 %v878_v24, %v877_v15  ;;  %v891_v33 = vadd.f32 %v890_v25, %v889_v16  ;;  %v1258_v34 = vmul.f32 0.25, %v872_v23  ;;  %v897_v36 = vrot.slane %v896_v27, 2 }
  0xd1   : > { %v886_v37 = vadd.f32 %v885_v28, %v884_v20  ;;  %v1509_v38 = vsel %vm1434_vm3, %v1257_v29, %v1508_v30  ;;  %v902_v39 = vrot.slane %v901_v31, 4  ;;  %v908_v40 = vsel %vm277_vm0, %v237_v26, 0.0 }
  0xd2   : > { %v892_v41 = vrot.slane %v891_v33, 1  ;;  %v1259_v42 = vmul.f32 0.25, %v879_v32  ;;  %v1510_v43 = vsel %vm1436_vm4, %v1258_v34, %v1509_v38  ;;  %v898_v45 = vadd.f32 %v897_v36, %v896_v27  ;;  %v244_v34 = vld [vmem:[%s2429_s19 + $0x308] sm:$0xff] }
  0xd3   : > { %v1260_v46 = vmul.f32 0.25, %v886_v37  ;;  %v903_v47 = vadd.f32 %v902_v39, %v901_v31  ;;  %v909_v48 = vrot.slane %v908_v40, 4  ;;  %v915_v49 = vsel %vm277_vm0, %v238_v35, 0.0 }
  0xd4   : > { %v893_v50 = vadd.f32 %v892_v41, %v891_v33  ;;  %v1511_v51 = vsel %vm1438_vm5, %v1259_v42, %v1510_v43  ;;  %v899_v54 = vrot.slane %v898_v45, 1  ;;  %v916_v55 = vrot.slane %v915_v49, 4  ;;  %v245_v43 = vld [vmem:[%s2429_s19 + $0x310] sm:$0xff] }
  0xd5   : > { %v1512_v56 = vsel %vm1440_vm6, %v1260_v46, %v1511_v51  ;;  %v904_v57 = vrot.slane %v903_v47, 2  ;;  %v910_v58 = vadd.f32 %v909_v48, %v908_v40  ;;  %v922_v59 = vsel %vm277_vm0, %v239_v44, 0.0 }
  0xd6   : > { %v1261_v60 = vmul.f32 0.25, %v893_v50  ;;  %v900_v62 = vadd.f32 %v899_v54, %v898_v45  ;;  %v917_v63 = vadd.f32 %v916_v55, %v915_v49  ;;  %v923_v0 = vrot.slane %v922_v59, 4 }
  0xd7   : > { %v905_v1 = vadd.f32 %v904_v57, %v903_v47  ;;  %v911_v2 = vrot.slane %v910_v58, 2  ;;  %v929_v3 = vsel %vm277_vm0, %v240_v52, 0.0  ;;  %v936_v4 = vsel %vm277_vm0, %v241_v53, 0.0  ;;  %v246_v52 = vld [vmem:[%s2429_s19 + $0x318] sm:$0xff] }
  0xd8   : > { %v1513_v5 = vsel %vm1442_vm7, %v1261_v60, %v1512_v56  ;;  %v918_v6 = vrot.slane %v917_v63, 2  ;;  %v924_v7 = vadd.f32 %v923_v0, %v922_v59  ;;  %v930_v8 = vrot.slane %v929_v3, 4  ;;  %v247_v60 = vld [vmem:[%s2429_s19 + $0x320] sm:$0xff] }
  0xd9   : > { %2274 = vmatprep.mubr.msk.f32.mxu0 %vm277_vm0, %v1513_v5  ;;  %v906_v9 = vrot.slane %v905_v1, 1  ;;  %v912_v10 = vadd.f32 %v911_v2, %v910_v58  ;;  %v937_v11 = vrot.slane %v936_v4, 4  ;;  %v943_v12 = vsel %vm277_vm0, %v242_v61, 0.0  ;;  %v249_v5 = vld [vmem:[%s2429_s19 + $0x330] sm:$0xff] }
  0xda   : > { %v919_v13 = vadd.f32 %v918_v6, %v917_v63  ;;  %v925_v14 = vrot.slane %v924_v7, 2  ;;  %v931_v15 = vadd.f32 %v930_v8, %v929_v3  ;;  %v944_v16 = vrot.slane %v943_v12, 4 }
  0xdb   : > { %v907_v18 = vadd.f32 %v906_v9, %v905_v1  ;;  %v913_v19 = vrot.slane %v912_v10, 1  ;;  %v938_v20 = vadd.f32 %v937_v11, %v936_v4  ;;  %v1262_v21 = vmul.f32 0.25, %v900_v62  ;;  %v248_v4 = vld [vmem:[%s2429_s19 + $0x328] sm:$0xff] }
  0xdc   : > { %v920_v22 = vrot.slane %v919_v13, 1  ;;  %v926_v23 = vadd.f32 %v925_v14, %v924_v7  ;;  %v932_v24 = vrot.slane %v931_v15, 2  ;;  %v945_v25 = vadd.f32 %v944_v16, %v943_v12 }
  0xdd   : > { %v914_v26 = vadd.f32 %v913_v19, %v912_v10  ;;  %v939_v27 = vrot.slane %v938_v20, 2  ;;  %v1263_v28 = vmul.f32 0.25, %v907_v18  ;;  %v950_v29 = vsel %vm277_vm0, %v243_v17, 0.0 }
  0xde   : > { %v921_v30 = vadd.f32 %v920_v22, %v919_v13  ;;  %v927_v31 = vrot.slane %v926_v23, 1  ;;  %v933_v32 = vadd.f32 %v932_v24, %v931_v15  ;;  %v946_v33 = vrot.slane %v945_v25, 2  ;;  %v250_v13 = vld [vmem:[%s2429_s19 + $0x338] sm:$0xff] }
  0xdf   : > { %v940_v35 = vadd.f32 %v939_v27, %v938_v20  ;;  %v1264_v36 = vmul.f32 0.25, %v914_v26  ;;  %v1514_v37 = vsel %vm1430_vm1, %v1263_v28, %v1262_v21  ;;  %v951_v38 = vrot.slane %v950_v29, 4 }
  0xe0   : > { %v928_v39 = vadd.f32 %v927_v31, %v926_v23  ;;  %v934_v40 = vrot.slane %v933_v32, 1  ;;  %v947_v41 = vadd.f32 %v946_v33, %v945_v25  ;;  %v1265_v42 = vmul.f32 0.25, %v921_v30  ;;  %v251_v25 = vld [vmem:[%s2429_s19 + $0x340] sm:$0xff] }
  0xe1   : > { %v941_v44 = vrot.slane %v940_v35, 1  ;;  %v1515_v45 = vsel %vm1432_vm2, %v1264_v36, %v1514_v37  ;;  %v952_v46 = vadd.f32 %v951_v38, %v950_v29  ;;  %v957_v47 = vsel %vm277_vm0, %v244_v34, 0.0 }
  0xe2   : > { %v935_v48 = vadd.f32 %v934_v40, %v933_v32  ;;  %v948_v49 = vrot.slane %v947_v41, 1  ;;  %v1266_v50 = vmul.f32 0.25, %v928_v39  ;;  %v1516_v51 = vsel %vm1434_vm3, %v1265_v42, %v1515_v45 }
  0xe3   : > { %v942_v53 = vadd.f32 %v941_v44, %v940_v35  ;;  %v953_v54 = vrot.slane %v952_v46, 2  ;;  %v958_v55 = vrot.slane %v957_v47, 4  ;;  %v964_v56 = vsel %vm277_vm0, %v245_v43, 0.0 }
  0xe4   : > { %v949_v57 = vadd.f32 %v948_v49, %v947_v41  ;;  %v1267_v58 = vmul.f32 0.25, %v935_v48  ;;  %v1517_v59 = vsel %vm1436_vm4, %v1266_v50, %v1516_v51  ;;  %v965_v61 = vrot.slane %v964_v56, 4  ;;  %v252_v50 = vld [vmem:[%s2429_s19 + $0x348] sm:$0xff] }
  0xe5   : > { %v1268_v62 = vmul.f32 0.25, %v942_v53  ;;  %v954_v63 = vadd.f32 %v953_v54, %v952_v46  ;;  %v959_v0 = vadd.f32 %v958_v55, %v957_v47  ;;  %v971_v1 = vsel %vm277_vm0, %v246_v52, 0.0 }
  0xe6   : > { %v1269_v2 = vmul.f32 0.25, %v949_v57  ;;  %v1518_v3 = vsel %vm1438_vm5, %v1267_v58, %v1517_v59  ;;  %v966_v6 = vadd.f32 %v965_v61, %v964_v56  ;;  %v972_v7 = vrot.slane %v971_v1, 4  ;;  %v253_v59 = vld [vmem:[%s2429_s19 + $0x350] sm:$0xff] }
  0xe7   : > { %v1519_v8 = vsel %vm1440_vm6, %v1268_v62, %v1518_v3  ;;  %v955_v9 = vrot.slane %v954_v63, 1  ;;  %v960_v10 = vrot.slane %v959_v0, 2  ;;  %v978_v11 = vsel %vm277_vm0, %v247_v60, 0.0  ;;  %v254_v3 = vld [vmem:[%s2429_s19 + $0x358] sm:$0xff] }
  0xe8   : > { %v1520_v12 = vsel %vm1442_vm7, %v1269_v2, %v1519_v8  ;;  %v967_v14 = vrot.slane %v966_v6, 2  ;;  %v973_v15 = vadd.f32 %v972_v7, %v971_v1  ;;  %v979_v16 = vrot.slane %v978_v11, 4 }
  0xe9   : > { %2275 = vmatmul.mubr.msk.f32.gmra.mxu0 %vm277_vm0, %v1520_v12  ;;  %v956_v17 = vadd.f32 %v955_v9, %v954_v63  ;;  %v961_v18 = vadd.f32 %v960_v10, %v959_v0  ;;  %v985_v19 = vsel %vm277_vm0, %v248_v4, 0.0  ;;  %v992_v20 = vsel %vm277_vm0, %v249_v5, 0.0 }
  0xea   : > { %v968_v21 = vadd.f32 %v967_v14, %v966_v6  ;;  %v974_v22 = vrot.slane %v973_v15, 2  ;;  %v980_v23 = vadd.f32 %v979_v16, %v978_v11  ;;  %v986_v24 = vrot.slane %v985_v19, 4  ;;  %v255_v11 = vld [vmem:[%s2429_s19 + $0x360] sm:$0xff] }
  0xeb   : > { %v962_v26 = vrot.slane %v961_v18, 1  ;;  %v993_v27 = vrot.slane %v992_v20, 4  ;;  %v999_v28 = vsel %vm277_vm0, %v250_v13, 0.0  ;;  %v1270_v29 = vmul.f32 0.25, %v956_v17 }
  0xec   : > { %v969_v30 = vrot.slane %v968_v21, 1  ;;  %v975_v31 = vadd.f32 %v974_v22, %v973_v15  ;;  %v981_v32 = vrot.slane %v980_v23, 2  ;;  %v987_v33 = vadd.f32 %v986_v24, %v985_v19  ;;  %v256_v19 = vld [vmem:[%s2429_s19 + $0x368] sm:$0xff] }
  0xed   : > { %v963_v34 = vadd.f32 %v962_v26, %v961_v18  ;;  %v994_v35 = vadd.f32 %v993_v27, %v992_v20  ;;  %v1000_v36 = vrot.slane %v999_v28, 4  ;;  %v1006_v37 = vsel %vm277_vm0, %v251_v25, 0.0  ;;  %v257_v20 = vld [vmem:[%s2429_s19 + $0x370] sm:$0xff] }
  0xee   : > { %v970_v38 = vadd.f32 %v969_v30, %v968_v21  ;;  %v976_v39 = vrot.slane %v975_v31, 1  ;;  %v982_v40 = vadd.f32 %v981_v32, %v980_v23  ;;  %v988_v41 = vrot.slane %v987_v33, 2  ;;  %v258_v21 = vld [vmem:[%s2429_s19 + $0x378] sm:$0xff] }
  0xef   : > { %v995_v42 = vrot.slane %v994_v35, 2  ;;  %v1001_v43 = vadd.f32 %v1000_v36, %v999_v28  ;;  %v1271_v44 = vmul.f32 0.25, %v963_v34  ;;  %v1007_v45 = vrot.slane %v1006_v37, 4 }
  0xf0   : > { %v977_v46 = vadd.f32 %v976_v39, %v975_v31  ;;  %v983_v47 = vrot.slane %v982_v40, 1  ;;  %v989_v48 = vadd.f32 %v988_v41, %v987_v33  ;;  %v1272_v49 = vmul.f32 0.25, %v970_v38  ;;  %v259_v41 = vld [vmem:[%s2429_s19 + $0x380] sm:$0xff] }
  0xf1   : > { %v996_v51 = vadd.f32 %v995_v42, %v994_v35  ;;  %v1002_v52 = vrot.slane %v1001_v43, 2  ;;  %v1521_v53 = vsel %vm1430_vm1, %v1271_v44, %v1270_v29  ;;  %v1008_v54 = vadd.f32 %v1007_v45, %v1006_v37 }
  0xf2   : > { %v984_v55 = vadd.f32 %v983_v47, %v982_v40  ;;  %v990_v56 = vrot.slane %v989_v48, 1  ;;  %v1273_v57 = vmul.f32 0.25, %v977_v46  ;;  %v1522_v58 = vsel %vm1432_vm2, %v1272_v49, %v1521_v53 }
  0xf3   : > { %v997_v60 = vrot.slane %v996_v51, 1  ;;  %v1003_v61 = vadd.f32 %v1002_v52, %v1001_v43  ;;  %v1009_v62 = vrot.slane %v1008_v54, 2  ;;  %v1013_v63 = vsel %vm277_vm0, %v252_v50, 0.0 }
  0xf4   : > { %v991_v0 = vadd.f32 %v990_v56, %v989_v48  ;;  %v1274_v1 = vmul.f32 0.25, %v984_v55  ;;  %v1523_v2 = vsel %vm1434_vm3, %v1273_v57, %v1522_v58  ;;  %v1014_v4 = vrot.slane %v1013_v63, 4 }
  0xf5   : > { %v998_v5 = vadd.f32 %v997_v60, %v996_v51  ;;  %v1004_v6 = vrot.slane %v1003_v61, 1  ;;  %v1010_v7 = vadd.f32 %v1009_v62, %v1008_v54  ;;  %v1020_v8 = vsel %vm277_vm0, %v253_v59, 0.0 }
  0xf6   : > { %v1275_v9 = vmul.f32 0.25, %v991_v0  ;;  %v1524_v10 = vsel %vm1436_vm4, %v1274_v1, %v1523_v2  ;;  %v1015_v12 = vadd.f32 %v1014_v4, %v1013_v63  ;;  %v1021_v13 = vrot.slane %v1020_v8, 4 }
  0xf7   : > { %v1005_v14 = vadd.f32 %v1004_v6, %v1003_v61  ;;  %v1276_v15 = vmul.f32 0.25, %v998_v5  ;;  %v1011_v16 = vrot.slane %v1010_v7, 1  ;;  %v1027_v17 = vsel %vm277_vm0, %v254_v3, 0.0  ;;  %v260_v61 = vld [vmem:[%s2429_s19 + $0x388] sm:$0xff]  ;;  %v261_v6 = vld [vmem:[%s2429_s19 + $0x390] sm:$0xff] }
  0xf8   : > { %v1525_v18 = vsel %vm1438_vm5, %v1275_v9, %v1524_v10  ;;  %v1016_v22 = vrot.slane %v1015_v12, 2  ;;  %v1022_v23 = vadd.f32 %v1021_v13, %v1020_v8  ;;  %v1028_v24 = vrot.slane %v1027_v17, 4 }
  0xf9   : > { %v1277_v25 = vmul.f32 0.25, %v1005_v14  ;;  %v1526_v26 = vsel %vm1440_vm6, %v1276_v15, %v1525_v18  ;;  %v1012_v27 = vadd.f32 %v1011_v16, %v1010_v7  ;;  %v1034_v28 = vsel %vm277_vm0, %v255_v11, 0.0  ;;  %v262_v15 = vld [vmem:[%s2429_s19 + $0x398] sm:$0xff] }
  0xfa   : > { %v1017_v29 = vadd.f32 %v1016_v22, %v1015_v12  ;;  %v1023_v30 = vrot.slane %v1022_v23, 2  ;;  %v1029_v31 = vadd.f32 %v1028_v24, %v1027_v17  ;;  %v1035_v32 = vrot.slane %v1034_v28, 4  ;;  %v263_v24 = vld [vmem:[%s2429_s19 + $0x3a0] sm:$0xff] }
  0xfb   : > { %v1527_v33 = vsel %vm1442_vm7, %v1277_v25, %v1526_v26  ;;  %v1041_v34 = vsel %vm277_vm0, %v256_v19, 0.0  ;;  %v1048_v35 = vsel %vm277_vm0, %v257_v20, 0.0  ;;  %v1055_v36 = vsel %vm277_vm0, %v258_v21, 0.0 }
  0xfc   : > { %2277 = vmatprep.mubr.msk.f32.mxu0 %vm277_vm0, %v1527_v33  ;;  %v1018_v37 = vrot.slane %v1017_v29, 1  ;;  %v1024_v38 = vadd.f32 %v1023_v30, %v1022_v23  ;;  %v1030_v39 = vrot.slane %v1029_v31, 2  ;;  %v1036_v40 = vadd.f32 %v1035_v32, %v1034_v28 }
  0xfd   : > { %v1042_v42 = vrot.slane %v1041_v34, 4  ;;  %v1049_v43 = vrot.slane %v1048_v35, 4  ;;  %v1056_v44 = vrot.slane %v1055_v36, 4  ;;  %v1278_v45 = vmul.f32 0.25, %v1012_v27  ;;  %v264_v27 = vld [vmem:[%s2429_s19 + $0x3a8] sm:$0xff] }
  0xfe   : > { %v1019_v46 = vadd.f32 %v1018_v37, %v1017_v29  ;;  %v1025_v47 = vrot.slane %v1024_v38, 1  ;;  %v1031_v48 = vadd.f32 %v1030_v39, %v1029_v31  ;;  %v1037_v49 = vrot.slane %v1036_v40, 2 }
  0xff   : > { %v1043_v50 = vadd.f32 %v1042_v42, %v1041_v34  ;;  %v1050_v51 = vadd.f32 %v1049_v43, %v1048_v35  ;;  %v1057_v52 = vadd.f32 %v1056_v44, %v1055_v36  ;;  %v1062_v53 = vsel %vm277_vm0, %v259_v41, 0.0  ;;  %v265_v35 = vld [vmem:[%s2429_s19 + $0x3b0] sm:$0xff] }
 0x100   : > { %v1026_v54 = vadd.f32 %v1025_v47, %v1024_v38  ;;  %v1032_v55 = vrot.slane %v1031_v48, 1  ;;  %v1038_v56 = vadd.f32 %v1037_v49, %v1036_v40  ;;  %v1279_v57 = vmul.f32 0.25, %v1019_v46 }
 0x101   : > { %v1044_v58 = vrot.slane %v1043_v50, 2  ;;  %v1051_v59 = vrot.slane %v1050_v51, 2  ;;  %v1058_v60 = vrot.slane %v1057_v52, 2  ;;  %v1063_v62 = vrot.slane %v1062_v53, 4 }
 0x102   : > { %v1033_v63 = vadd.f32 %v1032_v55, %v1031_v48  ;;  %v1039_v0 = vrot.slane %v1038_v56, 1  ;;  %v1280_v1 = vmul.f32 0.25, %v1026_v54  ;;  %v1528_v2 = vsel %vm1430_vm1, %v1279_v57, %v1278_v45  ;;  %v266_v45 = vld [vmem:[%s2429_s19 + $0x3b8] sm:$0xff]  ;;  %v267_v57 = vld [vmem:[%s2429_s19 + $0x3c0] sm:$0xff] }
 0x103   : > { %v1045_v3 = vadd.f32 %v1044_v58, %v1043_v50  ;;  %v1052_v4 = vadd.f32 %v1051_v59, %v1050_v51  ;;  %v1059_v5 = vadd.f32 %v1058_v60, %v1057_v52  ;;  %v1064_v7 = vadd.f32 %v1063_v62, %v1062_v53 }
 0x104   : > { %v1040_v8 = vadd.f32 %v1039_v0, %v1038_v56  ;;  %v1281_v9 = vmul.f32 0.25, %v1033_v63  ;;  %v1529_v10 = vsel %vm1432_vm2, %v1280_v1, %v1528_v2  ;;  %v1069_v11 = vsel %vm277_vm0, %v260_v61, 0.0 }
 0x105   : > { %v1046_v12 = vrot.slane %v1045_v3, 1  ;;  %v1053_v13 = vrot.slane %v1052_v4, 1  ;;  %v1060_v14 = vrot.slane %v1059_v5, 1  ;;  %v1065_v16 = vrot.slane %v1064_v7, 2 }
 0x106   : > { %v1282_v17 = vmul.f32 0.25, %v1040_v8  ;;  %v1530_v18 = vsel %vm1434_vm3, %v1281_v9, %v1529_v10  ;;  %v1070_v19 = vrot.slane %v1069_v11, 4  ;;  %v1076_v20 = vsel %vm277_vm0, %v261_v6, 0.0 }
 0x107   : > { %v1047_v21 = vadd.f32 %v1046_v12, %v1045_v3  ;;  %v1054_v22 = vadd.f32 %v1053_v13, %v1052_v4  ;;  %v1061_v23 = vadd.f32 %v1060_v14, %v1059_v5  ;;  %v1066_v25 = vadd.f32 %v1065_v16, %v1064_v7  ;;  %v268_v13 = vld [vmem:[%s2429_s19 + $0x3c8] sm:$0xff] }
 0x108   : > { %v1531_v26 = vsel %vm1436_vm4, %v1282_v17, %v1530_v18  ;;  %v1071_v28 = vadd.f32 %v1070_v19, %v1069_v11  ;;  %v1077_v29 = vrot.slane %v1076_v20, 4  ;;  %v1083_v30 = vsel %vm277_vm0, %v262_v15, 0.0 }
 0x109   : > { %v1283_v31 = vmul.f32 0.25, %v1047_v21  ;;  %v1284_v32 = vmul.f32 0.25, %v1054_v22  ;;  %v1285_v33 = vmul.f32 0.25, %v1061_v23  ;;  %v1067_v34 = vrot.slane %v1066_v25, 1  ;;  %v269_v22 = vld [vmem:[%s2429_s19 + $0x3d0] sm:$0xff] }
 0x10a   : > { %v1072_v36 = vrot.slane %v1071_v28, 2  ;;  %v1078_v37 = vadd.f32 %v1077_v29, %v1076_v20  ;;  %v1084_v38 = vrot.slane %v1083_v30, 4  ;;  %v1090_v39 = vsel %vm277_vm0, %v263_v24, 0.0 }
 0x10b   : > { %v1532_v40 = vsel %vm1438_vm5, %v1283_v31, %v1531_v26  ;;  %v1068_v41 = vadd.f32 %v1067_v34, %v1066_v25  ;;  %v1091_v42 = vrot.slane %v1090_v39, 4  ;;  %v1097_v43 = vsel %vm277_vm0, %v264_v27, 0.0  ;;  %v270_v31 = vld [vmem:[%s2429_s19 + $0x3d8] sm:$0xff] }
 0x10c   : > { %v1533_v44 = vsel %vm1440_vm6, %v1284_v32, %v1532_v40  ;;  %v1073_v46 = vadd.f32 %v1072_v36, %v1071_v28  ;;  %v1079_v47 = vrot.slane %v1078_v37, 2  ;;  %v1085_v48 = vadd.f32 %v1084_v38, %v1083_v30  ;;  %v271_v40 = vld [vmem:[%s2429_s19 + $0x3e0] sm:$0xff] }
 0x10d   : > { %v1534_v49 = vsel %vm1442_vm7, %v1285_v33, %v1533_v44  ;;  %v1092_v50 = vadd.f32 %v1091_v42, %v1090_v39  ;;  %v1098_v51 = vrot.slane %v1097_v43, 4  ;;  %v1104_v52 = vsel %vm277_vm0, %v265_v35, 0.0  ;;  %v2795_v42 = vpop.f32.mrf.mxu0 }
 0x10e   : > { %2278 = vmatmul.mubr.msk.f32.gmra.mxu0 %vm277_vm0, %v1534_v49  ;;  %v1074_v53 = vrot.slane %v1073_v46, 1  ;;  %v1080_v54 = vadd.f32 %v1079_v47, %v1078_v37  ;;  %v1086_v55 = vrot.slane %v1085_v48, 2  ;;  %v1105_v56 = vrot.slane %v1104_v52, 4  ;;  %v272_v49 = vld [vmem:[%s2429_s19 + $0x3e8] sm:$0xff] }
 0x10f   : > { %v1093_v58 = vrot.slane %v1092_v50, 2  ;;  %v1099_v59 = vadd.f32 %v1098_v51, %v1097_v43  ;;  %v1111_v60 = vsel %vm277_vm0, %v266_v45, 0.0  ;;  %v1286_v61 = vmul.f32 0.25, %v1068_v41 }
 0x110   : > { %v1075_v62 = vadd.f32 %v1074_v53, %v1073_v46  ;;  %v1081_v63 = vrot.slane %v1080_v54, 1  ;;  %v1087_v0 = vadd.f32 %v1086_v55, %v1085_v48  ;;  %v1106_v1 = vadd.f32 %v1105_v56, %v1104_v52 }
 0x111   : > { %v1094_v2 = vadd.f32 %v1093_v58, %v1092_v50  ;;  %v1100_v3 = vrot.slane %v1099_v59, 2  ;;  %v1112_v4 = vrot.slane %v1111_v60, 4  ;;  %v1118_v5 = vsel %vm277_vm0, %v267_v57, 0.0  ;;  %v273_v50 = vld [vmem:[%s2429_s19 + $0x3f0] sm:$0xff]  ;;  %v274_v58 = vld [vmem:[%s2429_s19 + $0x3f8] sm:$0xff] }
 0x112   : > { %v1082_v6 = vadd.f32 %v1081_v63, %v1080_v54  ;;  %v1088_v7 = vrot.slane %v1087_v0, 1  ;;  %v1107_v8 = vrot.slane %v1106_v1, 2  ;;  %v1287_v9 = vmul.f32 0.25, %v1075_v62  ;;  %v2804_v62 = vpop.f32.mrf.mxu0 }
 0x113   : > { %v1095_v10 = vrot.slane %v1094_v2, 1  ;;  %v1101_v11 = vadd.f32 %v1100_v3, %v1099_v59  ;;  %v1113_v12 = vadd.f32 %v1112_v4, %v1111_v60  ;;  %v1119_v14 = vrot.slane %v1118_v5, 4 }
 0x114   : > { %v1089_v15 = vadd.f32 %v1088_v7, %v1087_v0  ;;  %v1108_v16 = vadd.f32 %v1107_v8, %v1106_v1  ;;  %v1288_v17 = vmul.f32 0.25, %v1082_v6  ;;  %v1535_v18 = vsel %vm1430_vm1, %v1287_v9, %v1286_v61 }
 0x115   : > { %v1096_v19 = vadd.f32 %v1095_v10, %v1094_v2  ;;  %v1102_v20 = vrot.slane %v1101_v11, 1  ;;  %v1114_v21 = vrot.slane %v1113_v12, 2  ;;  %v1120_v23 = vadd.f32 %v1119_v14, %v1118_v5 }
 0x116   : > { %v1109_v24 = vrot.slane %v1108_v16, 1  ;;  %v1289_v25 = vmul.f32 0.25, %v1089_v15  ;;  %v1536_v26 = vsel %vm1432_vm2, %v1288_v17, %v1535_v18  ;;  %v1125_v27 = vsel %vm277_vm0, %v268_v13, 0.0 }
 0x117   : > { %v1103_v28 = vadd.f32 %v1102_v20, %v1101_v11  ;;  %v1115_v29 = vadd.f32 %v1114_v21, %v1113_v12  ;;  %v1290_v30 = vmul.f32 0.25, %v1096_v19  ;;  %v1121_v32 = vrot.slane %v1120_v23, 2 }
 0x118   : > { %v1110_v33 = vadd.f32 %v1109_v24, %v1108_v16  ;;  %v1537_v34 = vsel %vm1434_vm3, %v1289_v25, %v1536_v26  ;;  %v1126_v35 = vrot.slane %v1125_v27, 4  ;;  %v1132_v36 = vsel %vm277_vm0, %v269_v22, 0.0 }
 0x119   : > { %v1116_v37 = vrot.slane %v1115_v29, 1  ;;  %v1291_v38 = vmul.f32 0.25, %v1103_v28  ;;  %v1538_v39 = vsel %vm1436_vm4, %v1290_v30, %v1537_v34  ;;  %v1122_v41 = vadd.f32 %v1121_v32, %v1120_v23 }
 0x11a   : > { %v1292_v43 = vmul.f32 0.25, %v1110_v33  ;;  %v1127_v44 = vadd.f32 %v1126_v35, %v1125_v27  ;;  %v1133_v45 = vrot.slane %v1132_v36, 4  ;;  %v1139_v46 = vsel %vm277_vm0, %v270_v31, 0.0 }
 0x11b   : > { %v1117_v47 = vadd.f32 %v1116_v37, %v1115_v29  ;;  %v1539_v48 = vsel %vm1438_vm5, %v1291_v38, %v1538_v39  ;;  %v1123_v51 = vrot.slane %v1122_v41, 1  ;;  %v1140_v52 = vrot.slane %v1139_v46, 4 }
 0x11c   : > { %v1540_v53 = vsel %vm1440_vm6, %v1292_v43, %v1539_v48  ;;  %v1128_v54 = vrot.slane %v1127_v44, 2  ;;  %v1134_v55 = vadd.f32 %v1133_v45, %v1132_v36  ;;  %v1146_v56 = vsel %vm277_vm0, %v271_v40, 0.0 }
 0x11d   : > { %v1293_v57 = vmul.f32 0.25, %v1117_v47  ;;  %v1124_v59 = vadd.f32 %v1123_v51, %v1122_v41  ;;  %v1141_v60 = vadd.f32 %v1140_v52, %v1139_v46  ;;  %v1147_v61 = vrot.slane %v1146_v56, 4  ;;  %v2811_v15 = vpop.f32.mrf.mxu0 }
 0x11e   : > { %v1129_v63 = vadd.f32 %v1128_v54, %v1127_v44  ;;  %v1135_v0 = vrot.slane %v1134_v55, 2  ;;  %v1153_v1 = vsel %vm277_vm0, %v272_v49, 0.0  ;;  %v1160_v2 = vsel %vm277_vm0, %v273_v50, 0.0 }
 0x11f   : > { %v1541_v3 = vsel %vm1442_vm7, %v1293_v57, %v1540_v53  ;;  %v1142_v4 = vrot.slane %v1141_v60, 2  ;;  %v1148_v5 = vadd.f32 %v1147_v61, %v1146_v56  ;;  %v1154_v6 = vrot.slane %v1153_v1, 4  ;;  %v2813_v31 = vpop.f32.mrf.mxu0 }
 0x120   : > { %2280 = vmatprep.mubr.msk.f32.mxu0 %vm277_vm0, %v1541_v3  ;;  %v1130_v7 = vrot.slane %v1129_v63, 1  ;;  %v1136_v8 = vadd.f32 %v1135_v0, %v1134_v55  ;;  %v1161_v9 = vrot.slane %v1160_v2, 4  ;;  %v1167_v10 = vsel %vm277_vm0, %v274_v58, 0.0 }
 0x121   : > { %v1143_v11 = vadd.f32 %v1142_v4, %v1141_v60  ;;  %v1149_v12 = vrot.slane %v1148_v5, 2  ;;  %v1155_v13 = vadd.f32 %v1154_v6, %v1153_v1  ;;  %v1168_v14 = vrot.slane %v1167_v10, 4 }
 0x122   : > { %v1131_v16 = vadd.f32 %v1130_v7, %v1129_v63  ;;  %v1137_v17 = vrot.slane %v1136_v8, 1  ;;  %v1162_v18 = vadd.f32 %v1161_v9, %v1160_v2  ;;  %v1294_v19 = vmul.f32 0.25, %v1124_v59 }
 0x123   : > { %v1144_v20 = vrot.slane %v1143_v11, 1  ;;  %v1150_v21 = vadd.f32 %v1149_v12, %v1148_v5  ;;  %v1156_v22 = vrot.slane %v1155_v13, 2  ;;  %v1169_v23 = vadd.f32 %v1168_v14, %v1167_v10 }
 0x124   : > { %v1138_v24 = vadd.f32 %v1137_v17, %v1136_v8  ;;  %v1163_v25 = vrot.slane %v1162_v18, 2  ;;  %v1295_v26 = vmul.f32 0.25, %v1131_v16  ;;  %v1733_v35 = vsel %vm1732_vm8, %v2804_v62, -inf }
 0x125   : > { %v1145_v27 = vadd.f32 %v1144_v20, %v1143_v11  ;;  %v1151_v28 = vrot.slane %v1150_v21, 1  ;;  %v1157_v29 = vadd.f32 %v1156_v22, %v1155_v13  ;;  %v1170_v30 = vrot.slane %v1169_v23, 2  ;;  %1734 = vmax.xlane.f32.xlu0 %v1733_v35 }
 0x126   : > { %v1164_v32 = vadd.f32 %v1163_v25, %v1162_v18  ;;  %v1296_v33 = vmul.f32 0.25, %v1138_v24  ;;  %v1542_v34 = vsel %vm1430_vm1, %v1295_v26, %v1294_v19  ;;  %v1739_v43 = vsel %vm1732_vm8, %v2813_v31, -inf }
 0x127   : > { %v1152_v36 = vadd.f32 %v1151_v28, %v1150_v21  ;;  %v1158_v37 = vrot.slane %v1157_v29, 1  ;;  %v1171_v38 = vadd.f32 %v1170_v30, %v1169_v23  ;;  %v1297_v39 = vmul.f32 0.25, %v1145_v27  ;;  %1740 = vmax.xlane.f32.xlu1 %v1739_v43 }
 0x128   : > { %v1165_v40 = vrot.slane %v1164_v32, 1  ;;  %v1543_v41 = vsel %vm1432_vm2, %v1296_v33, %v1542_v34  ;;  %v1736_v49 = vsel %vm1732_vm8, %v2795_v42, -inf  ;;  %v1742_v54 = vsel %vm1732_vm8, %v2811_v15, -inf }
 0x129   : > { %v1159_v44 = vadd.f32 %v1158_v37, %v1157_v29  ;;  %v1172_v45 = vrot.slane %v1171_v38, 1  ;;  %v1298_v46 = vmul.f32 0.25, %v1152_v36  ;;  %v1544_v47 = vsel %vm1434_vm3, %v1297_v39, %v1543_v41  ;;  %1737 = vmax.xlane.f32.xlu0 %v1736_v49 }
 0x12a   : > { %v1166_v48 = vadd.f32 %v1165_v40, %v1164_v32 }
 0x12b   : > { %v1173_v50 = vadd.f32 %v1172_v45, %v1171_v38  ;;  %v1299_v51 = vmul.f32 0.25, %v1159_v44  ;;  %v1545_v52 = vsel %vm1436_vm4, %v1298_v46, %v1544_v47  ;;  %1743 = vmax.xlane.f32.xlu1 %v1742_v54 }
 0x12c   : > { %v1300_v53 = vmul.f32 0.25, %v1166_v48 }
 0x12d   : > { %v1301_v55 = vmul.f32 0.25, %v1173_v50  ;;  %v1546_v56 = vsel %vm1438_vm5, %v1299_v51, %v1545_v52 }
 0x12e   : > { %v1547_v57 = vsel %vm1440_vm6, %v1300_v53, %v1546_v56 }
 0x12f   : > { %v1548_v58 = vsel %vm1442_vm7, %v1301_v55, %v1547_v57 }
 0x130   : > { %2281 = vmatmul.mubr.msk.f32.gmra.mxu0 %vm277_vm0, %v1548_v58 }
 0x13f   : > { %v2267_v59 = vpop.f32.mrf.mxu0 }
 0x140   : > { %v1748_v60 = vsel %vm1732_vm8, %v2267_v59, -inf }
 0x141   : > { %v1673_v61 = vpop.f32.mrf.mxu0  ;;  %1749 = vmax.xlane.f32.xlu1 %v1748_v60 }
 0x142   : > { %v1745_v63 = vsel %vm1732_vm8, %v1673_v61, -inf }
 0x143   : > { %1746 = vmax.xlane.f32.xlu0 %v1745_v63 }
 0x162   : > { %v2270_v0 = vpop.f32.mrf.mxu0 }
 0x163   : > { %v1754_v1 = vsel %vm1732_vm8, %v2270_v0, -inf }
 0x164   : > { %v1683_v2 = vpop.f32.mrf.mxu0  ;;  %1755 = vmax.xlane.f32.xlu1 %v1754_v1 }
 0x165   : > { %v1751_v3 = vsel %vm1732_vm8, %v1683_v2, -inf }
 0x166   : > { %1752 = vmax.xlane.f32.xlu0 %v1751_v3 }
 0x187   : > { %v2835_v4 = vpop.f32.mrf.mxu0 }
 0x188   : > { %v1760_v5 = vsel %vm1732_vm8, %v2835_v4, -inf }
 0x189   : > { %v2839_v6 = vpop.f32.mrf.mxu0  ;;  %1761 = vmax.xlane.f32.xlu1 %v1760_v5 }
 0x18a   : > { %v1757_v7 = vsel %vm1732_vm8, %v2839_v6, -inf }
 0x18b   : > { %1758 = vmax.xlane.f32.xlu0 %v1757_v7 }
 0x1a9   : > { %v2843_v8 = vpop.f32.mrf.mxu0 }
 0x1aa   : > { %v1766_v9 = vsel %vm1732_vm8, %v2843_v8, -inf }
 0x1ab   : > { %v2847_v10 = vpop.f32.mrf.mxu0  ;;  %1767 = vmax.xlane.f32.xlu1 %v1766_v9 }
 0x1ac   : > { %v1763_v11 = vsel %vm1732_vm8, %v2847_v10, -inf }
 0x1ad   : > { %1764 = vmax.xlane.f32.xlu0 %v1763_v11 }
 0x1ae   : > { %v1735_v17 = vpop.xlane.xlu0 %1734 }
 0x1af   : > { %v1781_v22 = vsub.f32 %v2804_v62, %v1735_v17 }
 0x1b0   : > { %v1741_v18 = vpop.xlane.xlu1 %1740 }
 0x1b1   : > { %v1797_v25 = vmul.f32 1.442695, %v1781_v22  ;;  %v1783_v26 = vsub.f32 %v2813_v31, %v1741_v18 }
 0x1b2   : > { %v1738_v19 = vpop.xlane.xlu0 %1737 }
 0x1b3   : > { %v1782_v20 = vsub.f32 %v2795_v42, %v1738_v19  ;;  %v1801_v29 = vmul.f32 1.442695, %v1783_v26 }
 0x1b4   : > { %v1744_v21 = vpop.xlane.xlu1 %1743 }
 0x1b5   : > { %v1799_v23 = vmul.f32 1.442695, %v1782_v20  ;;  %v1784_v24 = vsub.f32 %v2811_v15, %v1744_v21 }
 0x1b7   : > { %2319 = vpow2.f32 %v1799_v23  ;;  %v1803_v28 = vmul.f32 1.442695, %v1784_v24 }
 0x1b8   : > { %2321 = vpow2.f32 %v1797_v25 }
 0x1b9   : > { %2323 = vpow2.f32 %v1803_v28 }
 0x1ba   : > { %2325 = vpow2.f32 %v1801_v29 }
 0x1c4   : > { %v2863_v15 = vpop.eup %2319 }
 0x1c5   : > { %v2869_v40 = vpop.eup %2321  ;;  %v1832_v45 = vsel %vm1732_vm8, %v2863_v15, 0.0 }
 0x1c6   : > { %v2877_v46 = vpop.eup %2323  ;;  %v1829_v47 = vsel %vm1732_vm8, %v2869_v40, 0.0 }
 0x1c7   : > { %v2881_v48 = vpop.eup %2325  ;;  %v1838_v49 = vsel %vm1732_vm8, %v2877_v46, 0.0 }
 0x1c8   : > { %v1835_v50 = vsel %vm1732_vm8, %v2881_v48, 0.0 }
 0x1ca   : > { %v1750_v32 = vpop.xlane.xlu1 %1749 }
 0x1cb   : > { %v1786_v33 = vsub.f32 %v2267_v59, %v1750_v32 }
 0x1cc   : > { %v1747_v27 = vpop.xlane.xlu0 %1746 }
 0x1cd   : > { %v1785_v30 = vsub.f32 %v1673_v61, %v1747_v27  ;;  %v1807_v34 = vmul.f32 1.442695, %v1786_v33 }
 0x1ce   : > { %v2851_v12 = vpop.f32.mrf.mxu0 }
 0x1cf   : > { %v1772_v13 = vsel %vm1732_vm8, %v2851_v12, -inf  ;;  %v1805_v42 = vmul.f32 1.442695, %v1785_v30 }
 0x1d0   : > { %v2855_v14 = vpop.f32.mrf.mxu0  ;;  %1773 = vmax.xlane.f32.xlu1 %v1772_v13 }
 0x1d1   : > { %v1769_v16 = vsel %vm1732_vm8, %v2855_v14, -inf  ;;  %2327 = vpow2.f32 %v1805_v42 }
 0x1d2   : > { %1770 = vmax.xlane.f32.xlu0 %v1769_v16  ;;  %2329 = vpow2.f32 %v1807_v34 }
 0x1de   : > { %v2887_v51 = vpop.eup %2327 }
 0x1df   : > { %v2889_v52 = vpop.eup %2329  ;;  %v1841_v53 = vsel %vm1732_vm8, %v2887_v51, 0.0 }
 0x1e0   : > { %v1844_v55 = vsel %vm1732_vm8, %v2889_v52, 0.0 }
 0x1ed   : > { %v1756_v62 = vpop.xlane.xlu1 %1755 }
 0x1ee   : > { %v1788_v35 = vsub.f32 %v2270_v0, %v1756_v62 }
 0x1ef   : > { %v1753_v36 = vpop.xlane.xlu0 %1752 }
 0x1f0   : > { %v2865_v37 = vpop.f32.mrf.mxu0  ;;  %v1787_v31 = vsub.f32 %v1683_v2, %v1753_v36  ;;  %v1811_v38 = vmul.f32 1.442695, %v1788_v35 }
 0x1f1   : > { %v1778_v39 = vsel %vm1732_vm8, %v2865_v37, -inf }
 0x1f2   : > { %v2871_v41 = vpop.f32.mrf.mxu0  ;;  %1779 = vmax.xlane.f32.xlu1 %v1778_v39  ;;  %v1809_v43 = vmul.f32 1.442695, %v1787_v31  ;;  %2331 = vpow2.f32 %v1811_v38 }
 0x1f3   : > { %v1775_v44 = vsel %vm1732_vm8, %v2871_v41, -inf }
 0x1f4   : > { %1776 = vmax.xlane.f32.xlu0 %v1775_v44  ;;  %2333 = vpow2.f32 %v1809_v43 }
 0x1f6   : > { %1833 = vadd.xlane.f32.xlu1 %v1832_v45 }
 0x1f8   : > { %1830 = vadd.xlane.f32.xlu0 %v1829_v47 }
 0x1fa   : > { %1839 = vadd.xlane.f32.xlu1 %v1838_v49 }
 0x1fc   : > { %1836 = vadd.xlane.f32.xlu0 %v1835_v50 }
 0x1fe   : > { %1845 = vadd.xlane.f32.xlu1 %v1844_v55 }
 0x1ff   : > { %v2893_v54 = vpop.eup %2331 }
 0x200   : > { %1842 = vadd.xlane.f32.xlu0 %v1841_v53  ;;  %v1850_v58 = vsel %vm1732_vm8, %v2893_v54, 0.0 }
 0x201   : > { %v2897_v56 = vpop.eup %2333 }
 0x202   : > { %v1847_v57 = vsel %vm1732_vm8, %v2897_v56, 0.0  ;;  %1851 = vadd.xlane.f32.xlu1 %v1850_v58 }
 0x204   : > { %1848 = vadd.xlane.f32.xlu0 %v1847_v57 }
 0x212   : > { %v1762_v59 = vpop.xlane.xlu1 %1761 }
 0x213   : > { %v1790_v60 = vsub.f32 %v2835_v4, %v1762_v59 }
 0x214   : > { %v1759_v61 = vpop.xlane.xlu0 %1758 }
 0x215   : > { %v1789_v63 = vsub.f32 %v2839_v6, %v1759_v61  ;;  %v1815_v0 = vmul.f32 1.442695, %v1790_v60 }
 0x217   : > { %v1813_v1 = vmul.f32 1.442695, %v1789_v63  ;;  %2335 = vpow2.f32 %v1815_v0 }
 0x219   : > { %2337 = vpow2.f32 %v1813_v1 }
 0x224   : > { %v2905_v2 = vpop.eup %2335 }
 0x225   : > { %v1856_v3 = vsel %vm1732_vm8, %v2905_v2, 0.0 }
 0x226   : > { %v2909_v5 = vpop.eup %2337  ;;  %1857 = vadd.xlane.f32.xlu1 %v1856_v3 }
 0x227   : > { %v1853_v7 = vsel %vm1732_vm8, %v2909_v5, 0.0 }
 0x228   : > { %1854 = vadd.xlane.f32.xlu0 %v1853_v7 }
 0x234   : > { %v1768_v4 = vpop.xlane.xlu1 %1767 }
 0x235   : > { %v1792_v9 = vsub.f32 %v2843_v8, %v1768_v4 }
 0x236   : > { %v1765_v6 = vpop.xlane.xlu0 %1764 }
 0x237   : > { %v1791_v11 = vsub.f32 %v2847_v10, %v1765_v6  ;;  %v1819_v13 = vmul.f32 1.442695, %v1792_v9 }
 0x239   : > { %v1817_v16 = vmul.f32 1.442695, %v1791_v11  ;;  %2339 = vpow2.f32 %v1819_v13 }
 0x23b   : > { %2341 = vpow2.f32 %v1817_v16 }
 0x246   : > { %v2915_v17 = vpop.eup %2339 }
 0x247   : > { %v1862_v18 = vsel %vm1732_vm8, %v2915_v17, 0.0 }
 0x248   : > { %v2919_v19 = vpop.eup %2341  ;;  %1863 = vadd.xlane.f32.xlu1 %v1862_v18 }
 0x249   : > { %v1859_v20 = vsel %vm1732_vm8, %v2919_v19, 0.0 }
 0x24a   : > { %1860 = vadd.xlane.f32.xlu0 %v1859_v20 }
 0x259   : > { %v1774_v8 = vpop.xlane.xlu1 %1773 }
 0x25a   : > { %v1794_v21 = vsub.f32 %v2851_v12, %v1774_v8 }
 0x25b   : > { %v1771_v10 = vpop.xlane.xlu0 %1770 }
 0x25c   : > { %v1793_v22 = vsub.f32 %v2855_v14, %v1771_v10  ;;  %v1823_v23 = vmul.f32 1.442695, %v1794_v21 }
 0x25e   : > { %v1821_v24 = vmul.f32 1.442695, %v1793_v22  ;;  %2343 = vpow2.f32 %v1823_v23 }
 0x260   : > { %2345 = vpow2.f32 %v1821_v24 }
 0x26b   : > { %v2925_v25 = vpop.eup %2343 }
 0x26c   : > { %v1868_v26 = vsel %vm1732_vm8, %v2925_v25, 0.0 }
 0x26d   : > { %v2929_v27 = vpop.eup %2345  ;;  %1869 = vadd.xlane.f32.xlu1 %v1868_v26 }
 0x26e   : > { %v1865_v28 = vsel %vm1732_vm8, %v2929_v27, 0.0 }
 0x26f   : > { %1866 = vadd.xlane.f32.xlu0 %v1865_v28 }
 0x27b   : > { %v1780_v12 = vpop.xlane.xlu1 %1779 }
 0x27c   : > { %v1796_v29 = vsub.f32 %v2865_v37, %v1780_v12 }
 0x27d   : > { %v1777_v14 = vpop.xlane.xlu0 %1776 }
 0x27e   : > { %v1795_v30 = vsub.f32 %v2871_v41, %v1777_v14  ;;  %v1827_v32 = vmul.f32 1.442695, %v1796_v29 }
 0x27f   : > { %v1834_v33 = vpop.xlane.xlu1 %1833 }
 0x280   : > { %v1825_v42 = vmul.f32 1.442695, %v1795_v30  ;;  %2347 = vpow2.f32 %v1827_v32 }
 0x281   : > { %v1831_v34 = vpop.xlane.xlu0 %1830  ;;  %2349 = vrcp.f32 %v1834_v33 }
 0x282   : > { %2351 = vpow2.f32 %v1825_v42 }
 0x283   : > { %2353 = vrcp.f32 %v1831_v34  ;;  %v1840_v62 = vpop.xlane.xlu1 %1839 }
 0x284   : > { %2355 = vrcp.f32 %v1840_v62 }
 0x285   : > { %v1837_v35 = vpop.xlane.xlu0 %1836 }
 0x286   : > { %2357 = vrcp.f32 %v1837_v35 }
 0x287   : > { %v1846_v31 = vpop.xlane.xlu1 %1845 }
 0x289   : > { %v1843_v36 = vpop.xlane.xlu0 %1842 }
 0x28a   : > { %2359 = vrcp.f32 %v1843_v36 }
 0x28b   : > { %2361 = vrcp.f32 %v1846_v31  ;;  %v1852_v43 = vpop.xlane.xlu1 %1851 }
 0x28d   : > { %v2935_v37 = vpop.eup %2347  ;;  %v1849_v38 = vpop.xlane.xlu0 %1848 }
 0x28e   : > { %v2350_v39 = vpop.eup %2349  ;;  %v1874_v41 = vsel %vm1732_vm8, %v2935_v37, 0.0  ;;  %2363 = vrcp.f32 %v1849_v38 }
 0x28f   : > { %v2939_v44 = vpop.eup %2351  ;;  %1875 = vadd.xlane.f32.xlu1 %v1874_v41  ;;  %2365 = vrcp.f32 %v1852_v43  ;;  %v1880_v49 = vmul.f32 %v2350_v39, %v2863_v15 }
 0x290   : > { %v2354_v45 = vpop.eup %2353  ;;  %v1871_v47 = vsel %vm1732_vm8, %v2939_v44, 0.0 }
 0x291   : > { %v2356_v50 = vpop.eup %2355  ;;  %1872 = vadd.xlane.f32.xlu0 %v1871_v47  ;;  %v1878_v53 = vmul.f32 %v2354_v45, %v2869_v40 }
 0x292   : > { %v1884_v58 = vmul.f32 %v2356_v50, %v2877_v46 }
 0x293   : > { %v2358_v55 = vpop.eup %2357  ;;  %2287 = vmatprep.mubr.msk.f32.mxu1 %vm1732_vm8, %v1878_v53 }
 0x294   : > { %2288 = vmatmul.mubr.msk.f32.vlgmr.msra.gmra.mxu1 %vm1732_vm8, %v1880_v49  ;;  %v1882_v57 = vmul.f32 %v2358_v55, %v2881_v48 }
 0x296   : > { %2290 = vmatprep.mubr.msk.f32.mxu1 %vm1732_vm8, %v1882_v57 }
 0x297   : > { %v2360_v59 = vpop.eup %2359 }
 0x298   : > { %v2362_v60 = vpop.eup %2361  ;;  %2291 = vmatmul.mubr.msk.f32.gmra.mxu1 %vm1732_vm8, %v1884_v58  ;;  %v1886_v15 = vmul.f32 %v2360_v59, %v2887_v51 }
 0x299   : > { %v1888_v61 = vmul.f32 %v2362_v60, %v2889_v52 }
 0x29a   : > { %2293 = vmatprep.mubr.msk.f32.mxu1 %vm1732_vm8, %v1886_v15 }
 0x29b   : > { %v2364_v40 = vpop.eup %2363 }
 0x29c   : > { %v2366_v63 = vpop.eup %2365  ;;  %2294 = vmatmul.mubr.msk.f32.gmra.mxu1 %vm1732_vm8, %v1888_v61  ;;  %v1890_v48 = vmul.f32 %v2364_v40, %v2897_v56 }
 0x29d   : > { %v1892_v46 = vmul.f32 %v2366_v63, %v2893_v54 }
 0x29e   : > { %2296 = vmatprep.mubr.msk.f32.mxu1 %vm1732_vm8, %v1890_v48 }
 0x2a0   : > { %2297 = vmatmul.mubr.msk.f32.gmra.mxu1 %vm1732_vm8, %v1892_v46 }
 0x2af   : > { %v1858_v0 = vpop.xlane.xlu1 %1857 }
 0x2b0   : > { %2367 = vrcp.f32 %v1858_v0 }
 0x2b1   : > { %v1855_v1 = vpop.xlane.xlu0 %1854 }
 0x2b2   : > { %2369 = vrcp.f32 %v1855_v1 }
 0x2bd   : > { %v2368_v51 = vpop.eup %2367 }
 0x2be   : > { %v1896_v3 = vmul.f32 %v2368_v51, %v2905_v2 }
 0x2bf   : > { %v2370_v52 = vpop.eup %2369 }
 0x2c0   : > { %v1894_v7 = vmul.f32 %v2370_v52, %v2909_v5 }
 0x2c2   : > { %2299 = vmatprep.mubr.msk.f32.mxu1 %vm1732_vm8, %v1894_v7 }
 0x2c3   : > { %2300 = vmatmul.mubr.msk.f32.gmra.mxu1 %vm1732_vm8, %v1896_v3 }
 0x2d1   : > { %v1864_v56 = vpop.xlane.xlu1 %1863 }
 0x2d2   : > { %2371 = vrcp.f32 %v1864_v56 }
 0x2d3   : > { %v1861_v54 = vpop.xlane.xlu0 %1860 }
 0x2d4   : > { %2373 = vrcp.f32 %v1861_v54 }
 0x2df   : > { %v2372_v4 = vpop.eup %2371 }
 0x2e0   : > { %v1900_v6 = vmul.f32 %v2372_v4, %v2915_v17 }
 0x2e1   : > { %v2374_v9 = vpop.eup %2373 }
 0x2e2   : > { %v1898_v11 = vmul.f32 %v2374_v9, %v2919_v19 }
 0x2e4   : > { %2302 = vmatprep.mubr.msk.f32.mxu1 %vm1732_vm8, %v1898_v11 }
 0x2e5   : > { %2303 = vmatmul.mubr.msk.f32.gmra.mxu1 %vm1732_vm8, %v1900_v6 }
 0x2f6   : > { %v1870_v2 = vpop.xlane.xlu1 %1869 }
 0x2f7   : > { %2375 = vrcp.f32 %v1870_v2 }
 0x2f8   : > { %v1867_v5 = vpop.xlane.xlu0 %1866 }
 0x2f9   : > { %2377 = vrcp.f32 %v1867_v5 }
 0x304   : > { %v2376_v13 = vpop.eup %2375 }
 0x305   : > { %v1904_v18 = vmul.f32 %v2376_v13, %v2925_v25 }
 0x306   : > { %v2378_v16 = vpop.eup %2377 }
 0x307   : > { %v1902_v20 = vmul.f32 %v2378_v16, %v2929_v27 }
 0x309   : > { %2305 = vmatprep.mubr.msk.f32.mxu1 %vm1732_vm8, %v1902_v20 }
 0x30a   : > { %2306 = vmatmul.mubr.msk.f32.gmra.mxu1 %vm1732_vm8, %v1904_v18 }
 0x318   : > { %v1876_v17 = vpop.xlane.xlu1 %1875 }
 0x319   : > { %2379 = vrcp.f32 %v1876_v17 }
 0x31a   : > { %v1873_v19 = vpop.xlane.xlu0 %1872 }
 0x31b   : > { %2381 = vrcp.f32 %v1873_v19 }
 0x326   : > { %v2380_v8 = vpop.eup %2379 }
 0x327   : > { %v1908_v10 = vmul.f32 %v2380_v8, %v2935_v37 }
 0x328   : > { %v2382_v21 = vpop.eup %2381 }
 0x329   : > { %v1906_v22 = vmul.f32 %v2382_v21, %v2939_v44 }
 0x32b   : > { %2308 = vmatprep.mubr.msk.f32.mxu1 %vm1732_vm8, %v1906_v22 }
 0x32c   : > { %2309 = vmatmul.mubr.msk.f32.gmra.mxu1 %vm1732_vm8, %v1908_v10 }
 0x354   : > { %v2289_v23 = vpop.f32.mrf.mxu1 }
 0x355   : > { %2103 = vst.msk [vmem:[%s2980_s24 + $0x8] sm:$0xff] %vm277_vm0, %v2289_v23 }
 0x356   : > { %v2023_v24 = vpop.f32.mrf.mxu1 }
 0x357   : > { %2102 = vst.msk [vmem:[%s2980_s24] sm:$0xff] %vm277_vm0, %v2023_v24 }
 0x358   : > { %v2292_v25 = vpop.f32.mrf.mxu1 }
 0x359   : > { %2105 = vst.msk [vmem:[%s2980_s24 + $0x18] sm:$0xff] %vm277_vm0, %v2292_v25 }
 0x35a   : > { %v2033_v26 = vpop.f32.mrf.mxu1 }
 0x35b   : > { %2104 = vst.msk [vmem:[%s2980_s24 + $0x10] sm:$0xff] %vm277_vm0, %v2033_v26 }
 0x35c   : > { %v2295_v27 = vpop.f32.mrf.mxu1 }
 0x35d   : > { %2107 = vst.msk [vmem:[%s2980_s24 + $0x28] sm:$0xff] %vm277_vm0, %v2295_v27 }
 0x35e   : > { %v2043_v28 = vpop.f32.mrf.mxu1 }
 0x35f   : > { %2106 = vst.msk [vmem:[%s2980_s24 + $0x20] sm:$0xff] %vm277_vm0, %v2043_v28 }
 0x360   : > { %v2298_v12 = vpop.f32.mrf.mxu1 }
 0x361   : > { %2109 = vst.msk [vmem:[%s2980_s24 + $0x38] sm:$0xff] %vm277_vm0, %v2298_v12 }
 0x362   : > { %v2053_v29 = vpop.f32.mrf.mxu1 }
 0x363   : > { %2108 = vst.msk [vmem:[%s2980_s24 + $0x30] sm:$0xff] %vm277_vm0, %v2053_v29 }
 0x383   : > { %v2301_v14 = vpop.f32.mrf.mxu1 }
 0x384   : > { %2111 = vst.msk [vmem:[%s2980_s24 + $0x48] sm:$0xff] %vm277_vm0, %v2301_v14 }
 0x385   : > { %v2063_v30 = vpop.f32.mrf.mxu1 }
 0x386   : > { %2110 = vst.msk [vmem:[%s2980_s24 + $0x40] sm:$0xff] %vm277_vm0, %v2063_v30 }
 0x3a5   : > { %v2304_v32 = vpop.f32.mrf.mxu1 }
 0x3a6   : > { %2113 = vst.msk [vmem:[%s2980_s24 + $0x58] sm:$0xff] %vm277_vm0, %v2304_v32 }
 0x3a7   : > { %v2073_v33 = vpop.f32.mrf.mxu1 }
 0x3a8   : > { %2112 = vst.msk [vmem:[%s2980_s24 + $0x50] sm:$0xff] %vm277_vm0, %v2073_v33 }
 0x3ca   : > { %v2307_v42 = vpop.f32.mrf.mxu1 }
 0x3cb   : > { %2115 = vst.msk [vmem:[%s2980_s24 + $0x68] sm:$0xff] %vm277_vm0, %v2307_v42 }
 0x3cc   : > { %v2083_v34 = vpop.f32.mrf.mxu1 }
 0x3cd   : > { %2114 = vst.msk [vmem:[%s2980_s24 + $0x60] sm:$0xff] %vm277_vm0, %v2083_v34 }
 0x3ec   : > { %v2310_v62 = vpop.f32.mrf.mxu1 }
 0x3ed   : > { %2117 = vst.msk [vmem:[%s2980_s24 + $0x78] sm:$0xff] %vm277_vm0, %v2310_v62 }
 0x3ee   : > { %v2093_v35 = vpop.f32.mrf.mxu1 }
 0x3ef   : > { %2116 = vst.msk [vmem:[%s2980_s24 + $0x70] sm:$0xff] %vm277_vm0, %v2093_v35 }
 0x3f0 PF: > { %s12_s9 = sadd.s32 1, %s2389_s9  }
 0x3f1   : > { %p9_p5 = scmp.ge.s32.totalorder %s12_s9, 4  }
 0x3f3   :  { %11 = sbr.rel (!%p9_p5) target bundleno = 1 (0x1), region = 58 }

</bundles_post_ra>
